<compile_context>
chip_gen: v7x
topology: tpu7x:2x2x1
jax: 0.10.0
libtpu: 0.0.40
codegen_flags: <defaults>
</compile_context>

<pallas_src>
import math

import jax
import jax.numpy as jnp
from jax import lax
from jax.experimental import pallas as pl
from jax.experimental.pallas import tpu as pltpu


# Flip to True at production shapes: moves the softmax divide onto the
# otherwise-idle EUP slot (re-validate tolerances if enabled).
SOFTMAX_APPROX_RECIP = False

# Raises v5e's 16 MiB scoped default; safely under v7x's 64 MiB physical VMEM.
_VMEM_LIMIT_BYTES = 32 * 1024 * 1024


def _softmax_last(x):
    """Numerically-stable softmax over the last axis, reciprocal-multiply form."""
    m = jnp.max(x, axis=-1, keepdims=True)
    e = jnp.exp(x - m)
    s = jnp.sum(e, axis=-1, keepdims=True)
    return e * pl.reciprocal(s, approx=SOFTMAX_APPROX_RECIP)


def _nt(a, b):
    """a @ b.T via dot_general (contract last dims, no explicit transpose)."""
    return lax.dot_general(a, b, (((1,), (1,)), ((), ())),
                           preferred_element_type=jnp.float32)


def _adjust_landmarks(seq_len, num_landmarks):
    L = num_landmarks
    while seq_len % L != 0 and L > 1:
        L -= 1
    return L


def _pick_s_tile(S, max_tile=512):
    """Largest multiple-of-8 tile dividing S (or the full S if small)."""
    if S <= max_tile:
        return S
    t = max_tile - (max_tile % 8)
    while t >= 8:
        if S % t == 0:
            return t
        t -= 8
    return S


# ----------------------------- Stage 1 kernel ------------------------------ #
# grid = (B,).  Per head: projection matmuls from head-major weight slices
# (major-dim ref index, no lane slicing), landmark pooling with a resident
# (L, S) matrix, softmax kernels, and k3 @ v — each per-head result written
# with a single unmasked store at a major-dim head index.
def nystrom_stage1(q_in, k_in, v_in, pool, wq, bq, wk, bk, wv, bv,
                   *, num_heads, d_k, d_v):
    B, S, E = q_in.shape
    L = pool.shape[0]
    H, dk, dv = num_heads, d_k, d_v

    def kernel(pr, qr, kr, vr, wqr, bqr, wkr, bkr, wvr, bvr, k1o, k2o, kvo):
        xq, xk, xv = qr[0], kr[0], vr[0]          # (S, E) each, DMA'd once/batch
        P = pr[...]                                # (L, S) resident pooling matrix
        for h in range(H):                         # static unroll (small H)
            # Head selection = major-dim ref index on the weights (no lane slice).
            # Scaling is already folded into wq/bq/wk/bk host-side.
            q = jnp.dot(xq, wqr[h], preferred_element_type=jnp.float32) + bqr[h]
            k = jnp.dot(xk, wkr[h], preferred_element_type=jnp.float32) + bkr[h]
            v = jnp.dot(xv, wvr[h], preferred_element_type=jnp.float32) + bvr[h]
            k_land = jnp.dot(P, k, preferred_element_type=jnp.float32)   # (L, dk)
            q_land = jnp.dot(P, q, preferred_element_type=jnp.float32)   # (L, dk)
            k1 = _softmax_last(_nt(q, k_land))        # (S, L)
            k2 = _softmax_last(_nt(q_land, k_land))   # (L, L)
            k3 = _softmax_last(_nt(q_land, k))        # (L, S)
            kvh = jnp.dot(k3, v, preferred_element_type=jnp.float32)     # (L, dv)
            # Full-tile stores at a major-dim head index (no lane-offset masks).
            k1o[0, h] = k1
            k2o[0, h] = k2
            kvo[0, h] = kvh

    seq_spec = pl.BlockSpec((1, S, E), lambda b: (b, 0, 0))

    def resident(shape):
        # Constant block index -> DMA'd once, stays resident across grid steps.
        if len(shape) == 2:
            return pl.BlockSpec(shape, lambda b: (0, 0))
        return pl.BlockSpec(shape, lambda b: (0, 0, 0))

    return pl.pallas_call(
        kernel,
        out_shape=(
            jax.ShapeDtypeStruct((B, H, S, L), jnp.float32),   # kernel_1
            jax.ShapeDtypeStruct((B, H, L, L), jnp.float32),   # kernel_2
            jax.ShapeDtypeStruct((B, H, L, dv), jnp.float32),  # kernel_3 @ v
        ),
        grid=(B,),
        in_specs=[
            resident((L, S)),
            seq_spec, seq_spec, seq_spec,
            resident((H, E, dk)), resident((H, 1, dk)),
            resident((H, E, dk)), resident((H, 1, dk)),
            resident((H, E, dv)), resident((H, 1, dv)),
        ],
        out_specs=(
            pl.BlockSpec((1, H, S, L), lambda b: (b, 0, 0, 0)),
            pl.BlockSpec((1, H, L, L), lambda b: (b, 0, 0, 0)),
            pl.BlockSpec((1, H, L, dv), lambda b: (b, 0, 0, 0)),
        ),
        compiler_params=pltpu.CompilerParams(
            dimension_semantics=("parallel",),
            vmem_limit_bytes=_VMEM_LIMIT_BYTES),
    )(pool, q_in, k_in, v_in, wq, bq, wk, bk, wv, bv)


# ----------------------------- Stage 2 kernel ------------------------------ #
# grid = (B, S // ts).  Per-head combine k1_h @ w_h (no block-diagonal
# zero-FLOPs / zero-DMA), single head concat, residual add, custom LayerNorm.
def nystrom_stage2(k1, w, residual, ln_scale, ln_shift, *, eps=1e-6,
                   s_tile=None):
    B, H, S, L = k1.shape
    dv = w.shape[-1]
    E = residual.shape[-1]
    ts = _pick_s_tile(S) if s_tile is None else s_tile
    assert S % ts == 0

    def kernel(k1r, wr, resr, scr, shr, outr):
        heads = [jnp.dot(k1r[0, h], wr[0, h], preferred_element_type=jnp.float32)
                 for h in range(H)]                       # H x (ts, dv)
        att = jnp.concatenate(heads, axis=-1)             # (ts, H*dv == E)
        x = att + resr[0]
        mean = jnp.mean(x, axis=-1, keepdims=True)
        d = x - mean
        # torch.std default is unbiased (divide by N - 1).
        var = jnp.sum(d * d, axis=-1, keepdims=True) / (E - 1)
        div = jnp.sqrt(var) + eps + shr[...]               # shift in the denominator
        outr[0] = scr[...] * d * pl.reciprocal(div, approx=False)

    return pl.pallas_call(
        kernel,
        out_shape=jax.ShapeDtypeStruct((B, S, E), jnp.float32),
        grid=(B, S // ts),
        in_specs=[
            pl.BlockSpec((1, H, ts, L), lambda b, s: (b, 0, s, 0)),
            pl.BlockSpec((1, H, L, dv), lambda b, s: (b, 0, 0, 0)),
            pl.BlockSpec((1, ts, E), lambda b, s: (b, s, 0)),
            pl.BlockSpec((1, E), lambda b, s: (0, 0)),
            pl.BlockSpec((1, E), lambda b, s: (0, 0)),
        ],
        out_specs=pl.BlockSpec((1, ts, E), lambda b, s: (b, s, 0)),
        compiler_params=pltpu.CompilerParams(
            dimension_semantics=("parallel", "parallel"),
            vmem_limit_bytes=_VMEM_LIMIT_BYTES),
    )(k1, w, residual, ln_scale, ln_shift)


# ------------------------------- Full module ------------------------------- #
def fold_qk_scaling(params, d_k):
    """One-time host-side fold of the 1/sqrt(sqrt(d_k)) q/k scaling into the
    projection weights/biases (removes 2*S*H*dk in-kernel multiplies/step)."""
    scaling = 1.0 / math.sqrt(math.sqrt(d_k))
    folded = dict(params)
    for name in ("wq", "bq", "wk", "bk"):
        folded[name] = params[name] * scaling
    return folded


def nystrom_multihead_attention(query, key, value, residual_x, folded_params,
                                *, num_heads, d_k, d_v, num_landmarks):
    B, S, E = query.shape
    H, dk, dv = num_heads, d_k, d_v
    assert H * dv == E, "head concat width must equal embed dim for the residual"
    L = _adjust_landmarks(S, num_landmarks)
    seg = S // L
    # Static segment-mean pooling matrix (L, S): P @ x == per-segment means.
    row = jnp.arange(L)[:, None]
    col = jnp.arange(S)[None, :]
    pool = jnp.where(col // seg == row, 1.0 / seg, 0.0).astype(jnp.float32)

    k1, k2, kv = nystrom_stage1(
        query, key, value, pool,
        folded_params["wq"], folded_params["bq"],
        folded_params["wk"], folded_params["bk"],
        folded_params["wv"], folded_params["bv"],
        num_heads=H, d_k=dk, d_v=dv)

    # ---- glue (plain JAX): exact pseudo-inverse, tiny per-head fold -------- #
    # TODO(synk): torch.pinverse is an SVD-based exact pseudo-inverse with no
    # Pallas equivalent; kept in plain JAX (a fused Newton-Schulz iterative_inv
    # would avoid this round trip but changes the module's exact semantics).
    k2_inv = jnp.linalg.pinv(k2)                           # (B, H, L, L)
    w = jnp.einsum("bhij,bhjd->bhid", k2_inv, kv)          # (B, H, L, dv)

    return nystrom_stage2(k1, w, residual_x,
                          folded_params["ln_scale"], folded_params["ln_shift"])


# ------------------------------ JAX reference ------------------------------ #
def reference(query, key, value, residual_x, params, *, num_heads, d_k, d_v,
              num_landmarks):
    B, S, E = query.shape
    H, dk, dv = num_heads, d_k, d_v
    L = _adjust_landmarks(S, num_landmarks)
    seg = S // L
    scaling = 1.0 / math.sqrt(math.sqrt(dk))
    outs = []
    for h in range(H):
        q = (query @ params["wq"][h] + params["bq"][h]) * scaling
        k = (key @ params["wk"][h] + params["bk"][h]) * scaling
        v = value @ params["wv"][h] + params["bv"][h]
        k_land = k.reshape(B, L, seg, dk).mean(axis=2)
        q_land = q.reshape(B, L, seg, dk).mean(axis=2)
        k1 = jax.nn.softmax(jnp.einsum("bsd,bld->bsl", q, k_land), axis=-1)
        k2 = jax.nn.softmax(jnp.einsum("bmd,bld->bml", q_land, k_land), axis=-1)
        k3 = jax.nn.softmax(jnp.einsum("bld,bsd->bls", q_land, k), axis=-1)
        outs.append(jnp.einsum("bsl,blm,bmv->bsv",
                               k1, jnp.linalg.pinv(k2), k3 @ v))
    att = jnp.concatenate(outs, axis=-1)
    x = att + residual_x
    mean = x.mean(-1, keepdims=True)
    std = jnp.std(x, axis=-1, ddof=1, keepdims=True)
    div = std + 1e-6 + params["ln_shift"]
    return params["ln_scale"] * (x - mean) / div


if __name__ == "__main__":
    B, S, E = 2, 8, 32
    H, dk, dv = 4, 8, 8            # H * dv == E so residual add / LayerNorm match
    num_landmarks = 4

    key0 = jax.random.PRNGKey(0)
    ks = jax.random.split(key0, 10)
    f32 = jnp.float32
    query = jax.random.normal(ks[0], (B, S, E), f32)
    keyx = jax.random.normal(ks[1], (B, S, E), f32)
    value = jax.random.normal(ks[2], (B, S, E), f32)
    residual = jax.random.normal(ks[3], (B, S, E), f32)

    scale_w = 1.0 / math.sqrt(E)
    params = {
        # Head-major per-head Linear weights: head selection in the kernels is a
        # major-dim index, never a lane slice.
        "wq": jax.random.normal(ks[4], (H, E, dk), f32) * scale_w,
        "bq": jax.random.normal(ks[5], (H, 1, dk), f32) * 0.1,
        "wk": jax.random.normal(ks[6], (H, E, dk), f32) * scale_w,
        "bk": jax.random.normal(ks[7], (H, 1, dk), f32) * 0.1,
        "wv": jax.random.normal(ks[8], (H, E, dv), f32) * scale_w,
        "bv": jax.random.normal(ks[9], (H, 1, dv), f32) * 0.1,
        # LayerNorm params: scale=ones, shift=zeros (as in the module __init__).
        "ln_scale": jnp.ones((1, E), f32),
        "ln_shift": jnp.zeros((1, E), f32),
    }

    # One-time host-side weight fold of the d_k^-0.25 scaling.
    folded = fold_qk_scaling(params, dk)

    out = nystrom_multihead_attention(query, keyx, value, residual, folded,
                                      num_heads=H, d_k=dk, d_v=dv,
                                      num_landmarks=num_landmarks)
    out = jax.block_until_ready(out)

    ref = reference(query, keyx, value, residual, params,
                    num_heads=H, d_k=dk, d_v=dv, num_landmarks=num_landmarks)
    assert out.shape == (B, S, E)
    assert jnp.allclose(out, ref, rtol=1e-4, atol=1e-4), (
        f"max abs diff {jnp.max(jnp.abs(out - ref))}")

    print("KERNEL_OK")
</pallas_src>

<mosaic_0001>
module attributes {stable_mosaic.version = 11 : i64} {
  func.func @kernel(%arg0: i32, %arg1: memref<4x8xf32, #tpu.memory_space<vmem>>, %arg2: memref<1x8x32xf32, #tpu.memory_space<vmem>>, %arg3: memref<1x8x32xf32, #tpu.memory_space<vmem>>, %arg4: memref<1x8x32xf32, #tpu.memory_space<vmem>>, %arg5: memref<4x32x8xf32, #tpu.memory_space<vmem>>, %arg6: memref<4x1x8xf32, #tpu.memory_space<vmem>>, %arg7: memref<4x32x8xf32, #tpu.memory_space<vmem>>, %arg8: memref<4x1x8xf32, #tpu.memory_space<vmem>>, %arg9: memref<4x32x8xf32, #tpu.memory_space<vmem>>, %arg10: memref<4x1x8xf32, #tpu.memory_space<vmem>>, %arg11: memref<1x4x8x4xf32, #tpu.memory_space<vmem>>, %arg12: memref<1x4x4x4xf32, #tpu.memory_space<vmem>>, %arg13: memref<1x4x4x8xf32, #tpu.memory_space<vmem>>) attributes {dimension_semantics = [#tpu.dimension_semantics<parallel>], iteration_bounds = array<i64: 2>, scalar_prefetch = 0 : i64, scratch_operands = 0 : i64, tpu.core_type = #tpu.core_type<tc>, window_params = [{pipeline_mode = #tpu.pipeline_mode<synchronous>, transform_indices = @transform_0, window_bounds = array<i64: 4, 8>}, {transform_indices = @transform_1, window_bounds = array<i64: 1, 8, 32>}, {transform_indices = @transform_2, window_bounds = array<i64: 1, 8, 32>}, {transform_indices = @transform_3, window_bounds = array<i64: 1, 8, 32>}, {pipeline_mode = #tpu.pipeline_mode<synchronous>, transform_indices = @transform_4, window_bounds = array<i64: 4, 32, 8>}, {pipeline_mode = #tpu.pipeline_mode<synchronous>, transform_indices = @transform_5, window_bounds = array<i64: 4, 1, 8>}, {pipeline_mode = #tpu.pipeline_mode<synchronous>, transform_indices = @transform_6, window_bounds = array<i64: 4, 32, 8>}, {pipeline_mode = #tpu.pipeline_mode<synchronous>, transform_indices = @transform_7, window_bounds = array<i64: 4, 1, 8>}, {pipeline_mode = #tpu.pipeline_mode<synchronous>, transform_indices = @transform_8, window_bounds = array<i64: 4, 32, 8>}, {pipeline_mode = #tpu.pipeline_mode<synchronous>, transform_indices = @transform_9, window_bounds = array<i64: 4, 1, 8>}, {transform_indices = @transform_10, window_bounds = array<i64: 1, 4, 8, 4>}, {transform_indices = @transform_11, window_bounds = array<i64: 1, 4, 4, 4>}, {transform_indices = @transform_12, window_bounds = array<i64: 1, 4, 4, 8>}]} {
    %c0 = arith.constant 0 : index
    %c0_0 = arith.constant 0 : index
    %c0_1 = arith.constant 0 : index
    %0 = vector.load %arg2[%c0, %c0_0, %c0_1] : memref<1x8x32xf32, #tpu.memory_space<vmem>>, vector<1x8x32xf32>
    %1 = vector.shape_cast %0 : vector<1x8x32xf32> to vector<8x32xf32>
    %c0_2 = arith.constant 0 : index
    %c0_3 = arith.constant 0 : index
    %c0_4 = arith.constant 0 : index
    %2 = vector.load %arg3[%c0_2, %c0_3, %c0_4] : memref<1x8x32xf32, #tpu.memory_space<vmem>>, vector<1x8x32xf32>
    %3 = vector.shape_cast %2 : vector<1x8x32xf32> to vector<8x32xf32>
    %c0_5 = arith.constant 0 : index
    %c0_6 = arith.constant 0 : index
    %c0_7 = arith.constant 0 : index
    %4 = vector.load %arg4[%c0_5, %c0_6, %c0_7] : memref<1x8x32xf32, #tpu.memory_space<vmem>>, vector<1x8x32xf32>
    %5 = vector.shape_cast %4 : vector<1x8x32xf32> to vector<8x32xf32>
    %c0_8 = arith.constant 0 : index
    %c0_9 = arith.constant 0 : index
    %6 = vector.load %arg1[%c0_8, %c0_9] : memref<4x8xf32, #tpu.memory_space<vmem>>, vector<4x8xf32>
    %c0_10 = arith.constant 0 : index
    %c0_11 = arith.constant 0 : index
    %c0_12 = arith.constant 0 : index
    %7 = vector.load %arg5[%c0_10, %c0_11, %c0_12] : memref<4x32x8xf32, #tpu.memory_space<vmem>>, vector<1x32x8xf32>
    %8 = vector.shape_cast %7 : vector<1x32x8xf32> to vector<32x8xf32>
    %cst = arith.constant dense<0.000000e+00> : vector<8x8xf32>
    %9 = tpu.matmul %1, %8, %cst {dimension_numbers = #tpu.dot_dimension_numbers<[1], [0], [0], [1], [0, 0, 1, 1], [], []>} : vector<8x32xf32>, vector<32x8xf32>, vector<8x8xf32> -> vector<8x8xf32>
    %c0_13 = arith.constant 0 : index
    %c0_14 = arith.constant 0 : index
    %c0_15 = arith.constant 0 : index
    %10 = vector.load %arg6[%c0_13, %c0_14, %c0_15] : memref<4x1x8xf32, #tpu.memory_space<vmem>>, vector<1x1x8xf32>
    %11 = vector.shape_cast %10 : vector<1x1x8xf32> to vector<1x8xf32>
    %12 = vector.broadcast %11 : vector<1x8xf32> to vector<8x8xf32>
    %13 = arith.addf %9, %12 : vector<8x8xf32>
    %c0_16 = arith.constant 0 : index
    %c0_17 = arith.constant 0 : index
    %c0_18 = arith.constant 0 : index
    %14 = vector.load %arg7[%c0_16, %c0_17, %c0_18] : memref<4x32x8xf32, #tpu.memory_space<vmem>>, vector<1x32x8xf32>
    %15 = vector.shape_cast %14 : vector<1x32x8xf32> to vector<32x8xf32>
    %cst_19 = arith.constant dense<0.000000e+00> : vector<8x8xf32>
    %16 = tpu.matmul %3, %15, %cst_19 {dimension_numbers = #tpu.dot_dimension_numbers<[1], [0], [0], [1], [0, 0, 1, 1], [], []>} : vector<8x32xf32>, vector<32x8xf32>, vector<8x8xf32> -> vector<8x8xf32>
    %c0_20 = arith.constant 0 : index
    %c0_21 = arith.constant 0 : index
    %c0_22 = arith.constant 0 : index
    %17 = vector.load %arg8[%c0_20, %c0_21, %c0_22] : memref<4x1x8xf32, #tpu.memory_space<vmem>>, vector<1x1x8xf32>
    %18 = vector.shape_cast %17 : vector<1x1x8xf32> to vector<1x8xf32>
    %19 = vector.broadcast %18 : vector<1x8xf32> to vector<8x8xf32>
    %20 = arith.addf %16, %19 : vector<8x8xf32>
    %c0_23 = arith.constant 0 : index
    %c0_24 = arith.constant 0 : index
    %c0_25 = arith.constant 0 : index
    %21 = vector.load %arg9[%c0_23, %c0_24, %c0_25] : memref<4x32x8xf32, #tpu.memory_space<vmem>>, vector<1x32x8xf32>
    %22 = vector.shape_cast %21 : vector<1x32x8xf32> to vector<32x8xf32>
    %cst_26 = arith.constant dense<0.000000e+00> : vector<8x8xf32>
    %23 = tpu.matmul %5, %22, %cst_26 {dimension_numbers = #tpu.dot_dimension_numbers<[1], [0], [0], [1], [0, 0, 1, 1], [], []>} : vector<8x32xf32>, vector<32x8xf32>, vector<8x8xf32> -> vector<8x8xf32>
    %c0_27 = arith.constant 0 : index
    %c0_28 = arith.constant 0 : index
    %c0_29 = arith.constant 0 : index
    %24 = vector.load %arg10[%c0_27, %c0_28, %c0_29] : memref<4x1x8xf32, #tpu.memory_space<vmem>>, vector<1x1x8xf32>
    %25 = vector.shape_cast %24 : vector<1x1x8xf32> to vector<1x8xf32>
    %26 = vector.broadcast %25 : vector<1x8xf32> to vector<8x8xf32>
    %27 = arith.addf %23, %26 : vector<8x8xf32>
    %cst_30 = arith.constant dense<0.000000e+00> : vector<4x8xf32>
    %28 = tpu.matmul %6, %20, %cst_30 {dimension_numbers = #tpu.dot_dimension_numbers<[1], [0], [0], [1], [0, 0, 1, 1], [], []>} : vector<4x8xf32>, vector<8x8xf32>, vector<4x8xf32> -> vector<4x8xf32>
    %cst_31 = arith.constant dense<0.000000e+00> : vector<4x8xf32>
    %29 = tpu.matmul %6, %13, %cst_31 {dimension_numbers = #tpu.dot_dimension_numbers<[1], [0], [0], [1], [0, 0, 1, 1], [], []>} : vector<4x8xf32>, vector<8x8xf32>, vector<4x8xf32> -> vector<4x8xf32>
    %cst_32 = arith.constant dense<0.000000e+00> : vector<8x4xf32>
    %30 = tpu.matmul %13, %28, %cst_32 {dimension_numbers = #tpu.dot_dimension_numbers<[1], [1], [0], [0], [0, 0, 1, 0], [], []>} : vector<8x8xf32>, vector<4x8xf32>, vector<8x4xf32> -> vector<8x4xf32>
    %cst_33 = arith.constant dense<0xFF800000> : vector<8xf32>
    %31 = vector.multi_reduction <maximumf>, %30, %cst_33 [1] : vector<8x4xf32> to vector<8xf32>
    %32 = vector.shape_cast %31 : vector<8xf32> to vector<8x1xf32>
    %33 = vector.broadcast %32 : vector<8x1xf32> to vector<8x4xf32>
    %34 = arith.subf %30, %33 : vector<8x4xf32>
    %35 = math.exp %34 : vector<8x4xf32>
    %cst_34 = arith.constant dense<0.000000e+00> : vector<8xf32>
    %36 = vector.multi_reduction <add>, %35, %cst_34 [1] : vector<8x4xf32> to vector<8xf32>
    %37 = vector.shape_cast %36 : vector<8xf32> to vector<8x1xf32>
    %38 = tpu.reciprocal %37 : vector<8x1xf32> -> vector<8x1xf32>
    %39 = vector.broadcast %38 : vector<8x1xf32> to vector<8x4xf32>
    %40 = arith.mulf %35, %39 : vector<8x4xf32>
    %cst_35 = arith.constant dense<0.000000e+00> : vector<4x4xf32>
    %41 = tpu.matmul %29, %28, %cst_35 {dimension_numbers = #tpu.dot_dimension_numbers<[1], [1], [0], [0], [0, 0, 1, 0], [], []>} : vector<4x8xf32>, vector<4x8xf32>, vector<4x4xf32> -> vector<4x4xf32>
    %cst_36 = arith.constant dense<0xFF800000> : vector<4xf32>
    %42 = vector.multi_reduction <maximumf>, %41, %cst_36 [1] : vector<4x4xf32> to vector<4xf32>
    %43 = vector.shape_cast %42 : vector<4xf32> to vector<4x1xf32>
    %44 = vector.broadcast %43 : vector<4x1xf32> to vector<4x4xf32>
    %45 = arith.subf %41, %44 : vector<4x4xf32>
    %46 = math.exp %45 : vector<4x4xf32>
    %cst_37 = arith.constant dense<0.000000e+00> : vector<4xf32>
    %47 = vector.multi_reduction <add>, %46, %cst_37 [1] : vector<4x4xf32> to vector<4xf32>
    %48 = vector.shape_cast %47 : vector<4xf32> to vector<4x1xf32>
    %49 = tpu.reciprocal %48 : vector<4x1xf32> -> vector<4x1xf32>
    %50 = vector.broadcast %49 : vector<4x1xf32> to vector<4x4xf32>
    %51 = arith.mulf %46, %50 : vector<4x4xf32>
    %cst_38 = arith.constant dense<0.000000e+00> : vector<4x8xf32>
    %52 = tpu.matmul %29, %20, %cst_38 {dimension_numbers = #tpu.dot_dimension_numbers<[1], [1], [0], [0], [0, 0, 1, 0], [], []>} : vector<4x8xf32>, vector<8x8xf32>, vector<4x8xf32> -> vector<4x8xf32>
    %cst_39 = arith.constant dense<0xFF800000> : vector<4xf32>
    %53 = vector.multi_reduction <maximumf>, %52, %cst_39 [1] : vector<4x8xf32> to vector<4xf32>
    %54 = vector.shape_cast %53 : vector<4xf32> to vector<4x1xf32>
    %55 = vector.broadcast %54 : vector<4x1xf32> to vector<4x8xf32>
    %56 = arith.subf %52, %55 : vector<4x8xf32>
    %57 = math.exp %56 : vector<4x8xf32>
    %cst_40 = arith.constant dense<0.000000e+00> : vector<4xf32>
    %58 = vector.multi_reduction <add>, %57, %cst_40 [1] : vector<4x8xf32> to vector<4xf32>
    %59 = vector.shape_cast %58 : vector<4xf32> to vector<4x1xf32>
    %60 = tpu.reciprocal %59 : vector<4x1xf32> -> vector<4x1xf32>
    %61 = vector.broadcast %60 : vector<4x1xf32> to vector<4x8xf32>
    %62 = arith.mulf %57, %61 : vector<4x8xf32>
    %cst_41 = arith.constant dense<0.000000e+00> : vector<4x8xf32>
    %63 = tpu.matmul %62, %27, %cst_41 {dimension_numbers = #tpu.dot_dimension_numbers<[1], [0], [0], [1], [0, 0, 1, 1], [], []>} : vector<4x8xf32>, vector<8x8xf32>, vector<4x8xf32> -> vector<4x8xf32>
    %c0_42 = arith.constant 0 : index
    %c0_43 = arith.constant 0 : index
    %c0_44 = arith.constant 0 : index
    %c0_45 = arith.constant 0 : index
    %64 = vector.load %arg11[%c0_42, %c0_43, %c0_44, %c0_45] : memref<1x4x8x4xf32, #tpu.memory_space<vmem>>, vector<1x1x8x4xf32>
    %65 = vector.shape_cast %64 : vector<1x1x8x4xf32> to vector<8x4xf32>
    %66 = vector.shape_cast %40 : vector<8x4xf32> to vector<1x1x8x4xf32>
    tpu.vector_store %arg11[%c0_42, %c0_43, %c0_44, %c0_45], %66 {strides = array<i32>} : memref<1x4x8x4xf32, #tpu.memory_space<vmem>>, vector<1x1x8x4xf32>,
    %c0_46 = arith.constant 0 : index
    %c0_47 = arith.constant 0 : index
    %c0_48 = arith.constant 0 : index
    %c0_49 = arith.constant 0 : index
    %67 = vector.load %arg12[%c0_46, %c0_47, %c0_48, %c0_49] : memref<1x4x4x4xf32, #tpu.memory_space<vmem>>, vector<1x1x4x4xf32>
    %68 = vector.shape_cast %67 : vector<1x1x4x4xf32> to vector<4x4xf32>
    %69 = vector.shape_cast %51 : vector<4x4xf32> to vector<1x1x4x4xf32>
    tpu.vector_store %arg12[%c0_46, %c0_47, %c0_48, %c0_49], %69 {strides = array<i32>} : memref<1x4x4x4xf32, #tpu.memory_space<vmem>>, vector<1x1x4x4xf32>,
    %c0_50 = arith.constant 0 : index
    %c0_51 = arith.constant 0 : index
    %c0_52 = arith.constant 0 : index
    %c0_53 = arith.constant 0 : index
    %70 = vector.load %arg13[%c0_50, %c0_51, %c0_52, %c0_53] : memref<1x4x4x8xf32, #tpu.memory_space<vmem>>, vector<1x1x4x8xf32>
    %71 = vector.shape_cast %70 : vector<1x1x4x8xf32> to vector<4x8xf32>
    %72 = vector.shape_cast %63 : vector<4x8xf32> to vector<1x1x4x8xf32>
    tpu.vector_store %arg13[%c0_50, %c0_51, %c0_52, %c0_53], %72 {strides = array<i32>} : memref<1x4x4x8xf32, #tpu.memory_space<vmem>>, vector<1x1x4x8xf32>,
    %c1 = arith.constant 1 : index
    %c0_54 = arith.constant 0 : index
    %c0_55 = arith.constant 0 : index
    %73 = vector.load %arg5[%c1, %c0_54, %c0_55] : memref<4x32x8xf32, #tpu.memory_space<vmem>>, vector<1x32x8xf32>
    %74 = vector.shape_cast %73 : vector<1x32x8xf32> to vector<32x8xf32>
    %cst_56 = arith.constant dense<0.000000e+00> : vector<8x8xf32>
    %75 = tpu.matmul %1, %74, %cst_56 {dimension_numbers = #tpu.dot_dimension_numbers<[1], [0], [0], [1], [0, 0, 1, 1], [], []>} : vector<8x32xf32>, vector<32x8xf32>, vector<8x8xf32> -> vector<8x8xf32>
    %c1_57 = arith.constant 1 : index
    %c0_58 = arith.constant 0 : index
    %c0_59 = arith.constant 0 : index
    %76 = vector.load %arg6[%c1_57, %c0_58, %c0_59] : memref<4x1x8xf32, #tpu.memory_space<vmem>>, vector<1x1x8xf32>
    %77 = vector.shape_cast %76 : vector<1x1x8xf32> to vector<1x8xf32>
    %78 = vector.broadcast %77 : vector<1x8xf32> to vector<8x8xf32>
    %79 = arith.addf %75, %78 : vector<8x8xf32>
    %c1_60 = arith.constant 1 : index
    %c0_61 = arith.constant 0 : index
    %c0_62 = arith.constant 0 : index
    %80 = vector.load %arg7[%c1_60, %c0_61, %c0_62] : memref<4x32x8xf32, #tpu.memory_space<vmem>>, vector<1x32x8xf32>
    %81 = vector.shape_cast %80 : vector<1x32x8xf32> to vector<32x8xf32>
    %cst_63 = arith.constant dense<0.000000e+00> : vector<8x8xf32>
    %82 = tpu.matmul %3, %81, %cst_63 {dimension_numbers = #tpu.dot_dimension_numbers<[1], [0], [0], [1], [0, 0, 1, 1], [], []>} : vector<8x32xf32>, vector<32x8xf32>, vector<8x8xf32> -> vector<8x8xf32>
    %c1_64 = arith.constant 1 : index
    %c0_65 = arith.constant 0 : index
    %c0_66 = arith.constant 0 : index
    %83 = vector.load %arg8[%c1_64, %c0_65, %c0_66] : memref<4x1x8xf32, #tpu.memory_space<vmem>>, vector<1x1x8xf32>
    %84 = vector.shape_cast %83 : vector<1x1x8xf32> to vector<1x8xf32>
    %85 = vector.broadcast %84 : vector<1x8xf32> to vector<8x8xf32>
    %86 = arith.addf %82, %85 : vector<8x8xf32>
    %c1_67 = arith.constant 1 : index
    %c0_68 = arith.constant 0 : index
    %c0_69 = arith.constant 0 : index
    %87 = vector.load %arg9[%c1_67, %c0_68, %c0_69] : memref<4x32x8xf32, #tpu.memory_space<vmem>>, vector<1x32x8xf32>
    %88 = vector.shape_cast %87 : vector<1x32x8xf32> to vector<32x8xf32>
    %cst_70 = arith.constant dense<0.000000e+00> : vector<8x8xf32>
    %89 = tpu.matmul %5, %88, %cst_70 {dimension_numbers = #tpu.dot_dimension_numbers<[1], [0], [0], [1], [0, 0, 1, 1], [], []>} : vector<8x32xf32>, vector<32x8xf32>, vector<8x8xf32> -> vector<8x8xf32>
    %c1_71 = arith.constant 1 : index
    %c0_72 = arith.constant 0 : index
    %c0_73 = arith.constant 0 : index
    %90 = vector.load %arg10[%c1_71, %c0_72, %c0_73] : memref<4x1x8xf32, #tpu.memory_space<vmem>>, vector<1x1x8xf32>
    %91 = vector.shape_cast %90 : vector<1x1x8xf32> to vector<1x8xf32>
    %92 = vector.broadcast %91 : vector<1x8xf32> to vector<8x8xf32>
    %93 = arith.addf %89, %92 : vector<8x8xf32>
    %cst_74 = arith.constant dense<0.000000e+00> : vector<4x8xf32>
    %94 = tpu.matmul %6, %86, %cst_74 {dimension_numbers = #tpu.dot_dimension_numbers<[1], [0], [0], [1], [0, 0, 1, 1], [], []>} : vector<4x8xf32>, vector<8x8xf32>, vector<4x8xf32> -> vector<4x8xf32>
    %cst_75 = arith.constant dense<0.000000e+00> : vector<4x8xf32>
    %95 = tpu.matmul %6, %79, %cst_75 {dimension_numbers = #tpu.dot_dimension_numbers<[1], [0], [0], [1], [0, 0, 1, 1], [], []>} : vector<4x8xf32>, vector<8x8xf32>, vector<4x8xf32> -> vector<4x8xf32>
    %cst_76 = arith.constant dense<0.000000e+00> : vector<8x4xf32>
    %96 = tpu.matmul %79, %94, %cst_76 {dimension_numbers = #tpu.dot_dimension_numbers<[1], [1], [0], [0], [0, 0, 1, 0], [], []>} : vector<8x8xf32>, vector<4x8xf32>, vector<8x4xf32> -> vector<8x4xf32>
    %cst_77 = arith.constant dense<0xFF800000> : vector<8xf32>
    %97 = vector.multi_reduction <maximumf>, %96, %cst_77 [1] : vector<8x4xf32> to vector<8xf32>
    %98 = vector.shape_cast %97 : vector<8xf32> to vector<8x1xf32>
    %99 = vector.broadcast %98 : vector<8x1xf32> to vector<8x4xf32>
    %100 = arith.subf %96, %99 : vector<8x4xf32>
    %101 = math.exp %100 : vector<8x4xf32>
    %cst_78 = arith.constant dense<0.000000e+00> : vector<8xf32>
    %102 = vector.multi_reduction <add>, %101, %cst_78 [1] : vector<8x4xf32> to vector<8xf32>
    %103 = vector.shape_cast %102 : vector<8xf32> to vector<8x1xf32>
    %104 = tpu.reciprocal %103 : vector<8x1xf32> -> vector<8x1xf32>
    %105 = vector.broadcast %104 : vector<8x1xf32> to vector<8x4xf32>
    %106 = arith.mulf %101, %105 : vector<8x4xf32>
    %cst_79 = arith.constant dense<0.000000e+00> : vector<4x4xf32>
    %107 = tpu.matmul %95, %94, %cst_79 {dimension_numbers = #tpu.dot_dimension_numbers<[1], [1], [0], [0], [0, 0, 1, 0], [], []>} : vector<4x8xf32>, vector<4x8xf32>, vector<4x4xf32> -> vector<4x4xf32>
    %cst_80 = arith.constant dense<0xFF800000> : vector<4xf32>
    %108 = vector.multi_reduction <maximumf>, %107, %cst_80 [1] : vector<4x4xf32> to vector<4xf32>
    %109 = vector.shape_cast %108 : vector<4xf32> to vector<4x1xf32>
    %110 = vector.broadcast %109 : vector<4x1xf32> to vector<4x4xf32>
    %111 = arith.subf %107, %110 : vector<4x4xf32>
    %112 = math.exp %111 : vector<4x4xf32>
    %cst_81 = arith.constant dense<0.000000e+00> : vector<4xf32>
    %113 = vector.multi_reduction <add>, %112, %cst_81 [1] : vector<4x4xf32> to vector<4xf32>
    %114 = vector.shape_cast %113 : vector<4xf32> to vector<4x1xf32>
    %115 = tpu.reciprocal %114 : vector<4x1xf32> -> vector<4x1xf32>
    %116 = vector.broadcast %115 : vector<4x1xf32> to vector<4x4xf32>
    %117 = arith.mulf %112, %116 : vector<4x4xf32>
    %cst_82 = arith.constant dense<0.000000e+00> : vector<4x8xf32>
    %118 = tpu.matmul %95, %86, %cst_82 {dimension_numbers = #tpu.dot_dimension_numbers<[1], [1], [0], [0], [0, 0, 1, 0], [], []>} : vector<4x8xf32>, vector<8x8xf32>, vector<4x8xf32> -> vector<4x8xf32>
    %cst_83 = arith.constant dense<0xFF800000> : vector<4xf32>
    %119 = vector.multi_reduction <maximumf>, %118, %cst_83 [1] : vector<4x8xf32> to vector<4xf32>
    %120 = vector.shape_cast %119 : vector<4xf32> to vector<4x1xf32>
    %121 = vector.broadcast %120 : vector<4x1xf32> to vector<4x8xf32>
    %122 = arith.subf %118, %121 : vector<4x8xf32>
    %123 = math.exp %122 : vector<4x8xf32>
    %cst_84 = arith.constant dense<0.000000e+00> : vector<4xf32>
    %124 = vector.multi_reduction <add>, %123, %cst_84 [1] : vector<4x8xf32> to vector<4xf32>
    %125 = vector.shape_cast %124 : vector<4xf32> to vector<4x1xf32>
    %126 = tpu.reciprocal %125 : vector<4x1xf32> -> vector<4x1xf32>
    %127 = vector.broadcast %126 : vector<4x1xf32> to vector<4x8xf32>
    %128 = arith.mulf %123, %127 : vector<4x8xf32>
    %cst_85 = arith.constant dense<0.000000e+00> : vector<4x8xf32>
    %129 = tpu.matmul %128, %93, %cst_85 {dimension_numbers = #tpu.dot_dimension_numbers<[1], [0], [0], [1], [0, 0, 1, 1], [], []>} : vector<4x8xf32>, vector<8x8xf32>, vector<4x8xf32> -> vector<4x8xf32>
    %c0_86 = arith.constant 0 : index
    %c1_87 = arith.constant 1 : index
    %c0_88 = arith.constant 0 : index
    %c0_89 = arith.constant 0 : index
    %130 = vector.load %arg11[%c0_86, %c1_87, %c0_88, %c0_89] : memref<1x4x8x4xf32, #tpu.memory_space<vmem>>, vector<1x1x8x4xf32>
    %131 = vector.shape_cast %130 : vector<1x1x8x4xf32> to vector<8x4xf32>
    %132 = vector.shape_cast %106 : vector<8x4xf32> to vector<1x1x8x4xf32>
    tpu.vector_store %arg11[%c0_86, %c1_87, %c0_88, %c0_89], %132 {strides = array<i32>} : memref<1x4x8x4xf32, #tpu.memory_space<vmem>>, vector<1x1x8x4xf32>,
    %c0_90 = arith.constant 0 : index
    %c1_91 = arith.constant 1 : index
    %c0_92 = arith.constant 0 : index
    %c0_93 = arith.constant 0 : index
    %133 = vector.load %arg12[%c0_90, %c1_91, %c0_92, %c0_93] : memref<1x4x4x4xf32, #tpu.memory_space<vmem>>, vector<1x1x4x4xf32>
    %134 = vector.shape_cast %133 : vector<1x1x4x4xf32> to vector<4x4xf32>
    %135 = vector.shape_cast %117 : vector<4x4xf32> to vector<1x1x4x4xf32>
    tpu.vector_store %arg12[%c0_90, %c1_91, %c0_92, %c0_93], %135 {strides = array<i32>} : memref<1x4x4x4xf32, #tpu.memory_space<vmem>>, vector<1x1x4x4xf32>,
    %c0_94 = arith.constant 0 : index
    %c1_95 = arith.constant 1 : index
    %c0_96 = arith.constant 0 : index
    %c0_97 = arith.constant 0 : index
    %136 = vector.load %arg13[%c0_94, %c1_95, %c0_96, %c0_97] : memref<1x4x4x8xf32, #tpu.memory_space<vmem>>, vector<1x1x4x8xf32>
    %137 = vector.shape_cast %136 : vector<1x1x4x8xf32> to vector<4x8xf32>
    %138 = vector.shape_cast %129 : vector<4x8xf32> to vector<1x1x4x8xf32>
    tpu.vector_store %arg13[%c0_94, %c1_95, %c0_96, %c0_97], %138 {strides = array<i32>} : memref<1x4x4x8xf32, #tpu.memory_space<vmem>>, vector<1x1x4x8xf32>,
    %c2 = arith.constant 2 : index
    %c0_98 = arith.constant 0 : index
    %c0_99 = arith.constant 0 : index
    %139 = vector.load %arg5[%c2, %c0_98, %c0_99] : memref<4x32x8xf32, #tpu.memory_space<vmem>>, vector<1x32x8xf32>
    %140 = vector.shape_cast %139 : vector<1x32x8xf32> to vector<32x8xf32>
    %cst_100 = arith.constant dense<0.000000e+00> : vector<8x8xf32>
    %141 = tpu.matmul %1, %140, %cst_100 {dimension_numbers = #tpu.dot_dimension_numbers<[1], [0], [0], [1], [0, 0, 1, 1], [], []>} : vector<8x32xf32>, vector<32x8xf32>, vector<8x8xf32> -> vector<8x8xf32>
    %c2_101 = arith.constant 2 : index
    %c0_102 = arith.constant 0 : index
    %c0_103 = arith.constant 0 : index
    %142 = vector.load %arg6[%c2_101, %c0_102, %c0_103] : memref<4x1x8xf32, #tpu.memory_space<vmem>>, vector<1x1x8xf32>
    %143 = vector.shape_cast %142 : vector<1x1x8xf32> to vector<1x8xf32>
    %144 = vector.broadcast %143 : vector<1x8xf32> to vector<8x8xf32>
    %145 = arith.addf %141, %144 : vector<8x8xf32>
    %c2_104 = arith.constant 2 : index
    %c0_105 = arith.constant 0 : index
    %c0_106 = arith.constant 0 : index
    %146 = vector.load %arg7[%c2_104, %c0_105, %c0_106] : memref<4x32x8xf32, #tpu.memory_space<vmem>>, vector<1x32x8xf32>
    %147 = vector.shape_cast %146 : vector<1x32x8xf32> to vector<32x8xf32>
    %cst_107 = arith.constant dense<0.000000e+00> : vector<8x8xf32>
    %148 = tpu.matmul %3, %147, %cst_107 {dimension_numbers = #tpu.dot_dimension_numbers<[1], [0], [0], [1], [0, 0, 1, 1], [], []>} : vector<8x32xf32>, vector<32x8xf32>, vector<8x8xf32> -> vector<8x8xf32>
    %c2_108 = arith.constant 2 : index
    %c0_109 = arith.constant 0 : index
    %c0_110 = arith.constant 0 : index
    %149 = vector.load %arg8[%c2_108, %c0_109, %c0_110] : memref<4x1x8xf32, #tpu.memory_space<vmem>>, vector<1x1x8xf32>
    %150 = vector.shape_cast %149 : vector<1x1x8xf32> to vector<1x8xf32>
    %151 = vector.broadcast %150 : vector<1x8xf32> to vector<8x8xf32>
    %152 = arith.addf %148, %151 : vector<8x8xf32>
    %c2_111 = arith.constant 2 : index
    %c0_112 = arith.constant 0 : index
    %c0_113 = arith.constant 0 : index
    %153 = vector.load %arg9[%c2_111, %c0_112, %c0_113] : memref<4x32x8xf32, #tpu.memory_space<vmem>>, vector<1x32x8xf32>
    %154 = vector.shape_cast %153 : vector<1x32x8xf32> to vector<32x8xf32>
    %cst_114 = arith.constant dense<0.000000e+00> : vector<8x8xf32>
    %155 = tpu.matmul %5, %154, %cst_114 {dimension_numbers = #tpu.dot_dimension_numbers<[1], [0], [0], [1], [0, 0, 1, 1], [], []>} : vector<8x32xf32>, vector<32x8xf32>, vector<8x8xf32> -> vector<8x8xf32>
    %c2_115 = arith.constant 2 : index
    %c0_116 = arith.constant 0 : index
    %c0_117 = arith.constant 0 : index
    %156 = vector.load %arg10[%c2_115, %c0_116, %c0_117] : memref<4x1x8xf32, #tpu.memory_space<vmem>>, vector<1x1x8xf32>
    %157 = vector.shape_cast %156 : vector<1x1x8xf32> to vector<1x8xf32>
    %158 = vector.broadcast %157 : vector<1x8xf32> to vector<8x8xf32>
    %159 = arith.addf %155, %158 : vector<8x8xf32>
    %cst_118 = arith.constant dense<0.000000e+00> : vector<4x8xf32>
    %160 = tpu.matmul %6, %152, %cst_118 {dimension_numbers = #tpu.dot_dimension_numbers<[1], [0], [0], [1], [0, 0, 1, 1], [], []>} : vector<4x8xf32>, vector<8x8xf32>, vector<4x8xf32> -> vector<4x8xf32>
    %cst_119 = arith.constant dense<0.000000e+00> : vector<4x8xf32>
    %161 = tpu.matmul %6, %145, %cst_119 {dimension_numbers = #tpu.dot_dimension_numbers<[1], [0], [0], [1], [0, 0, 1, 1], [], []>} : vector<4x8xf32>, vector<8x8xf32>, vector<4x8xf32> -> vector<4x8xf32>
    %cst_120 = arith.constant dense<0.000000e+00> : vector<8x4xf32>
    %162 = tpu.matmul %145, %160, %cst_120 {dimension_numbers = #tpu.dot_dimension_numbers<[1], [1], [0], [0], [0, 0, 1, 0], [], []>} : vector<8x8xf32>, vector<4x8xf32>, vector<8x4xf32> -> vector<8x4xf32>
    %cst_121 = arith.constant dense<0xFF800000> : vector<8xf32>
    %163 = vector.multi_reduction <maximumf>, %162, %cst_121 [1] : vector<8x4xf32> to vector<8xf32>
    %164 = vector.shape_cast %163 : vector<8xf32> to vector<8x1xf32>
    %165 = vector.broadcast %164 : vector<8x1xf32> to vector<8x4xf32>
    %166 = arith.subf %162, %165 : vector<8x4xf32>
    %167 = math.exp %166 : vector<8x4xf32>
    %cst_122 = arith.constant dense<0.000000e+00> : vector<8xf32>
    %168 = vector.multi_reduction <add>, %167, %cst_122 [1] : vector<8x4xf32> to vector<8xf32>
    %169 = vector.shape_cast %168 : vector<8xf32> to vector<8x1xf32>
    %170 = tpu.reciprocal %169 : vector<8x1xf32> -> vector<8x1xf32>
    %171 = vector.broadcast %170 : vector<8x1xf32> to vector<8x4xf32>
    %172 = arith.mulf %167, %171 : vector<8x4xf32>
    %cst_123 = arith.constant dense<0.000000e+00> : vector<4x4xf32>
    %173 = tpu.matmul %161, %160, %cst_123 {dimension_numbers = #tpu.dot_dimension_numbers<[1], [1], [0], [0], [0, 0, 1, 0], [], []>} : vector<4x8xf32>, vector<4x8xf32>, vector<4x4xf32> -> vector<4x4xf32>
    %cst_124 = arith.constant dense<0xFF800000> : vector<4xf32>
    %174 = vector.multi_reduction <maximumf>, %173, %cst_124 [1] : vector<4x4xf32> to vector<4xf32>
    %175 = vector.shape_cast %174 : vector<4xf32> to vector<4x1xf32>
    %176 = vector.broadcast %175 : vector<4x1xf32> to vector<4x4xf32>
    %177 = arith.subf %173, %176 : vector<4x4xf32>
    %178 = math.exp %177 : vector<4x4xf32>
    %cst_125 = arith.constant dense<0.000000e+00> : vector<4xf32>
    %179 = vector.multi_reduction <add>, %178, %cst_125 [1] : vector<4x4xf32> to vector<4xf32>
    %180 = vector.shape_cast %179 : vector<4xf32> to vector<4x1xf32>
    %181 = tpu.reciprocal %180 : vector<4x1xf32> -> vector<4x1xf32>
    %182 = vector.broadcast %181 : vector<4x1xf32> to vector<4x4xf32>
    %183 = arith.mulf %178, %182 : vector<4x4xf32>
    %cst_126 = arith.constant dense<0.000000e+00> : vector<4x8xf32>
    %184 = tpu.matmul %161, %152, %cst_126 {dimension_numbers = #tpu.dot_dimension_numbers<[1], [1], [0], [0], [0, 0, 1, 0], [], []>} : vector<4x8xf32>, vector<8x8xf32>, vector<4x8xf32> -> vector<4x8xf32>
    %cst_127 = arith.constant dense<0xFF800000> : vector<4xf32>
    %185 = vector.multi_reduction <maximumf>, %184, %cst_127 [1] : vector<4x8xf32> to vector<4xf32>
    %186 = vector.shape_cast %185 : vector<4xf32> to vector<4x1xf32>
    %187 = vector.broadcast %186 : vector<4x1xf32> to vector<4x8xf32>
    %188 = arith.subf %184, %187 : vector<4x8xf32>
    %189 = math.exp %188 : vector<4x8xf32>
    %cst_128 = arith.constant dense<0.000000e+00> : vector<4xf32>
    %190 = vector.multi_reduction <add>, %189, %cst_128 [1] : vector<4x8xf32> to vector<4xf32>
    %191 = vector.shape_cast %190 : vector<4xf32> to vector<4x1xf32>
    %192 = tpu.reciprocal %191 : vector<4x1xf32> -> vector<4x1xf32>
    %193 = vector.broadcast %192 : vector<4x1xf32> to vector<4x8xf32>
    %194 = arith.mulf %189, %193 : vector<4x8xf32>
    %cst_129 = arith.constant dense<0.000000e+00> : vector<4x8xf32>
    %195 = tpu.matmul %194, %159, %cst_129 {dimension_numbers = #tpu.dot_dimension_numbers<[1], [0], [0], [1], [0, 0, 1, 1], [], []>} : vector<4x8xf32>, vector<8x8xf32>, vector<4x8xf32> -> vector<4x8xf32>
    %c0_130 = arith.constant 0 : index
    %c2_131 = arith.constant 2 : index
    %c0_132 = arith.constant 0 : index
    %c0_133 = arith.constant 0 : index
    %196 = vector.load %arg11[%c0_130, %c2_131, %c0_132, %c0_133] : memref<1x4x8x4xf32, #tpu.memory_space<vmem>>, vector<1x1x8x4xf32>
    %197 = vector.shape_cast %196 : vector<1x1x8x4xf32> to vector<8x4xf32>
    %198 = vector.shape_cast %172 : vector<8x4xf32> to vector<1x1x8x4xf32>
    tpu.vector_store %arg11[%c0_130, %c2_131, %c0_132, %c0_133], %198 {strides = array<i32>} : memref<1x4x8x4xf32, #tpu.memory_space<vmem>>, vector<1x1x8x4xf32>,
    %c0_134 = arith.constant 0 : index
    %c2_135 = arith.constant 2 : index
    %c0_136 = arith.constant 0 : index
    %c0_137 = arith.constant 0 : index
    %199 = vector.load %arg12[%c0_134, %c2_135, %c0_136, %c0_137] : memref<1x4x4x4xf32, #tpu.memory_space<vmem>>, vector<1x1x4x4xf32>
    %200 = vector.shape_cast %199 : vector<1x1x4x4xf32> to vector<4x4xf32>
    %201 = vector.shape_cast %183 : vector<4x4xf32> to vector<1x1x4x4xf32>
    tpu.vector_store %arg12[%c0_134, %c2_135, %c0_136, %c0_137], %201 {strides = array<i32>} : memref<1x4x4x4xf32, #tpu.memory_space<vmem>>, vector<1x1x4x4xf32>,
    %c0_138 = arith.constant 0 : index
    %c2_139 = arith.constant 2 : index
    %c0_140 = arith.constant 0 : index
    %c0_141 = arith.constant 0 : index
    %202 = vector.load %arg13[%c0_138, %c2_139, %c0_140, %c0_141] : memref<1x4x4x8xf32, #tpu.memory_space<vmem>>, vector<1x1x4x8xf32>
    %203 = vector.shape_cast %202 : vector<1x1x4x8xf32> to vector<4x8xf32>
    %204 = vector.shape_cast %195 : vector<4x8xf32> to vector<1x1x4x8xf32>
    tpu.vector_store %arg13[%c0_138, %c2_139, %c0_140, %c0_141], %204 {strides = array<i32>} : memref<1x4x4x8xf32, #tpu.memory_space<vmem>>, vector<1x1x4x8xf32>,
    %c3 = arith.constant 3 : index
    %c0_142 = arith.constant 0 : index
    %c0_143 = arith.constant 0 : index
    %205 = vector.load %arg5[%c3, %c0_142, %c0_143] : memref<4x32x8xf32, #tpu.memory_space<vmem>>, vector<1x32x8xf32>
    %206 = vector.shape_cast %205 : vector<1x32x8xf32> to vector<32x8xf32>
    %cst_144 = arith.constant dense<0.000000e+00> : vector<8x8xf32>
    %207 = tpu.matmul %1, %206, %cst_144 {dimension_numbers = #tpu.dot_dimension_numbers<[1], [0], [0], [1], [0, 0, 1, 1], [], []>} : vector<8x32xf32>, vector<32x8xf32>, vector<8x8xf32> -> vector<8x8xf32>
    %c3_145 = arith.constant 3 : index
    %c0_146 = arith.constant 0 : index
    %c0_147 = arith.constant 0 : index
    %208 = vector.load %arg6[%c3_145, %c0_146, %c0_147] : memref<4x1x8xf32, #tpu.memory_space<vmem>>, vector<1x1x8xf32>
    %209 = vector.shape_cast %208 : vector<1x1x8xf32> to vector<1x8xf32>
    %210 = vector.broadcast %209 : vector<1x8xf32> to vector<8x8xf32>
    %211 = arith.addf %207, %210 : vector<8x8xf32>
    %c3_148 = arith.constant 3 : index
    %c0_149 = arith.constant 0 : index
    %c0_150 = arith.constant 0 : index
    %212 = vector.load %arg7[%c3_148, %c0_149, %c0_150] : memref<4x32x8xf32, #tpu.memory_space<vmem>>, vector<1x32x8xf32>
    %213 = vector.shape_cast %212 : vector<1x32x8xf32> to vector<32x8xf32>
    %cst_151 = arith.constant dense<0.000000e+00> : vector<8x8xf32>
    %214 = tpu.matmul %3, %213, %cst_151 {dimension_numbers = #tpu.dot_dimension_numbers<[1], [0], [0], [1], [0, 0, 1, 1], [], []>} : vector<8x32xf32>, vector<32x8xf32>, vector<8x8xf32> -> vector<8x8xf32>
    %c3_152 = arith.constant 3 : index
    %c0_153 = arith.constant 0 : index
    %c0_154 = arith.constant 0 : index
    %215 = vector.load %arg8[%c3_152, %c0_153, %c0_154] : memref<4x1x8xf32, #tpu.memory_space<vmem>>, vector<1x1x8xf32>
    %216 = vector.shape_cast %215 : vector<1x1x8xf32> to vector<1x8xf32>
    %217 = vector.broadcast %216 : vector<1x8xf32> to vector<8x8xf32>
    %218 = arith.addf %214, %217 : vector<8x8xf32>
    %c3_155 = arith.constant 3 : index
    %c0_156 = arith.constant 0 : index
    %c0_157 = arith.constant 0 : index
    %219 = vector.load %arg9[%c3_155, %c0_156, %c0_157] : memref<4x32x8xf32, #tpu.memory_space<vmem>>, vector<1x32x8xf32>
    %220 = vector.shape_cast %219 : vector<1x32x8xf32> to vector<32x8xf32>
    %cst_158 = arith.constant dense<0.000000e+00> : vector<8x8xf32>
    %221 = tpu.matmul %5, %220, %cst_158 {dimension_numbers = #tpu.dot_dimension_numbers<[1], [0], [0], [1], [0, 0, 1, 1], [], []>} : vector<8x32xf32>, vector<32x8xf32>, vector<8x8xf32> -> vector<8x8xf32>
    %c3_159 = arith.constant 3 : index
    %c0_160 = arith.constant 0 : index
    %c0_161 = arith.constant 0 : index
    %222 = vector.load %arg10[%c3_159, %c0_160, %c0_161] : memref<4x1x8xf32, #tpu.memory_space<vmem>>, vector<1x1x8xf32>
    %223 = vector.shape_cast %222 : vector<1x1x8xf32> to vector<1x8xf32>
    %224 = vector.broadcast %223 : vector<1x8xf32> to vector<8x8xf32>
    %225 = arith.addf %221, %224 : vector<8x8xf32>
    %cst_162 = arith.constant dense<0.000000e+00> : vector<4x8xf32>
    %226 = tpu.matmul %6, %218, %cst_162 {dimension_numbers = #tpu.dot_dimension_numbers<[1], [0], [0], [1], [0, 0, 1, 1], [], []>} : vector<4x8xf32>, vector<8x8xf32>, vector<4x8xf32> -> vector<4x8xf32>
    %cst_163 = arith.constant dense<0.000000e+00> : vector<4x8xf32>
    %227 = tpu.matmul %6, %211, %cst_163 {dimension_numbers = #tpu.dot_dimension_numbers<[1], [0], [0], [1], [0, 0, 1, 1], [], []>} : vector<4x8xf32>, vector<8x8xf32>, vector<4x8xf32> -> vector<4x8xf32>
    %cst_164 = arith.constant dense<0.000000e+00> : vector<8x4xf32>
    %228 = tpu.matmul %211, %226, %cst_164 {dimension_numbers = #tpu.dot_dimension_numbers<[1], [1], [0], [0], [0, 0, 1, 0], [], []>} : vector<8x8xf32>, vector<4x8xf32>, vector<8x4xf32> -> vector<8x4xf32>
    %cst_165 = arith.constant dense<0xFF800000> : vector<8xf32>
    %229 = vector.multi_reduction <maximumf>, %228, %cst_165 [1] : vector<8x4xf32> to vector<8xf32>
    %230 = vector.shape_cast %229 : vector<8xf32> to vector<8x1xf32>
    %231 = vector.broadcast %230 : vector<8x1xf32> to vector<8x4xf32>
    %232 = arith.subf %228, %231 : vector<8x4xf32>
    %233 = math.exp %232 : vector<8x4xf32>
    %cst_166 = arith.constant dense<0.000000e+00> : vector<8xf32>
    %234 = vector.multi_reduction <add>, %233, %cst_166 [1] : vector<8x4xf32> to vector<8xf32>
    %235 = vector.shape_cast %234 : vector<8xf32> to vector<8x1xf32>
    %236 = tpu.reciprocal %235 : vector<8x1xf32> -> vector<8x1xf32>
    %237 = vector.broadcast %236 : vector<8x1xf32> to vector<8x4xf32>
    %238 = arith.mulf %233, %237 : vector<8x4xf32>
    %cst_167 = arith.constant dense<0.000000e+00> : vector<4x4xf32>
    %239 = tpu.matmul %227, %226, %cst_167 {dimension_numbers = #tpu.dot_dimension_numbers<[1], [1], [0], [0], [0, 0, 1, 0], [], []>} : vector<4x8xf32>, vector<4x8xf32>, vector<4x4xf32> -> vector<4x4xf32>
    %cst_168 = arith.constant dense<0xFF800000> : vector<4xf32>
    %240 = vector.multi_reduction <maximumf>, %239, %cst_168 [1] : vector<4x4xf32> to vector<4xf32>
    %241 = vector.shape_cast %240 : vector<4xf32> to vector<4x1xf32>
    %242 = vector.broadcast %241 : vector<4x1xf32> to vector<4x4xf32>
    %243 = arith.subf %239, %242 : vector<4x4xf32>
    %244 = math.exp %243 : vector<4x4xf32>
    %cst_169 = arith.constant dense<0.000000e+00> : vector<4xf32>
    %245 = vector.multi_reduction <add>, %244, %cst_169 [1] : vector<4x4xf32> to vector<4xf32>
    %246 = vector.shape_cast %245 : vector<4xf32> to vector<4x1xf32>
    %247 = tpu.reciprocal %246 : vector<4x1xf32> -> vector<4x1xf32>
    %248 = vector.broadcast %247 : vector<4x1xf32> to vector<4x4xf32>
    %249 = arith.mulf %244, %248 : vector<4x4xf32>
    %cst_170 = arith.constant dense<0.000000e+00> : vector<4x8xf32>
    %250 = tpu.matmul %227, %218, %cst_170 {dimension_numbers = #tpu.dot_dimension_numbers<[1], [1], [0], [0], [0, 0, 1, 0], [], []>} : vector<4x8xf32>, vector<8x8xf32>, vector<4x8xf32> -> vector<4x8xf32>
    %cst_171 = arith.constant dense<0xFF800000> : vector<4xf32>
    %251 = vector.multi_reduction <maximumf>, %250, %cst_171 [1] : vector<4x8xf32> to vector<4xf32>
    %252 = vector.shape_cast %251 : vector<4xf32> to vector<4x1xf32>
    %253 = vector.broadcast %252 : vector<4x1xf32> to vector<4x8xf32>
    %254 = arith.subf %250, %253 : vector<4x8xf32>
    %255 = math.exp %254 : vector<4x8xf32>
    %cst_172 = arith.constant dense<0.000000e+00> : vector<4xf32>
    %256 = vector.multi_reduction <add>, %255, %cst_172 [1] : vector<4x8xf32> to vector<4xf32>
    %257 = vector.shape_cast %256 : vector<4xf32> to vector<4x1xf32>
    %258 = tpu.reciprocal %257 : vector<4x1xf32> -> vector<4x1xf32>
    %259 = vector.broadcast %258 : vector<4x1xf32> to vector<4x8xf32>
    %260 = arith.mulf %255, %259 : vector<4x8xf32>
    %cst_173 = arith.constant dense<0.000000e+00> : vector<4x8xf32>
    %261 = tpu.matmul %260, %225, %cst_173 {dimension_numbers = #tpu.dot_dimension_numbers<[1], [0], [0], [1], [0, 0, 1, 1], [], []>} : vector<4x8xf32>, vector<8x8xf32>, vector<4x8xf32> -> vector<4x8xf32>
    %c0_174 = arith.constant 0 : index
    %c3_175 = arith.constant 3 : index
    %c0_176 = arith.constant 0 : index
    %c0_177 = arith.constant 0 : index
    %262 = vector.load %arg11[%c0_174, %c3_175, %c0_176, %c0_177] : memref<1x4x8x4xf32, #tpu.memory_space<vmem>>, vector<1x1x8x4xf32>
    %263 = vector.shape_cast %262 : vector<1x1x8x4xf32> to vector<8x4xf32>
    %264 = vector.shape_cast %238 : vector<8x4xf32> to vector<1x1x8x4xf32>
    tpu.vector_store %arg11[%c0_174, %c3_175, %c0_176, %c0_177], %264 {strides = array<i32>} : memref<1x4x8x4xf32, #tpu.memory_space<vmem>>, vector<1x1x8x4xf32>,
    %c0_178 = arith.constant 0 : index
    %c3_179 = arith.constant 3 : index
    %c0_180 = arith.constant 0 : index
    %c0_181 = arith.constant 0 : index
    %265 = vector.load %arg12[%c0_178, %c3_179, %c0_180, %c0_181] : memref<1x4x4x4xf32, #tpu.memory_space<vmem>>, vector<1x1x4x4xf32>
    %266 = vector.shape_cast %265 : vector<1x1x4x4xf32> to vector<4x4xf32>
    %267 = vector.shape_cast %249 : vector<4x4xf32> to vector<1x1x4x4xf32>
    tpu.vector_store %arg12[%c0_178, %c3_179, %c0_180, %c0_181], %267 {strides = array<i32>} : memref<1x4x4x4xf32, #tpu.memory_space<vmem>>, vector<1x1x4x4xf32>,
    %c0_182 = arith.constant 0 : index
    %c3_183 = arith.constant 3 : index
    %c0_184 = arith.constant 0 : index
    %c0_185 = arith.constant 0 : index
    %268 = vector.load %arg13[%c0_182, %c3_183, %c0_184, %c0_185] : memref<1x4x4x8xf32, #tpu.memory_space<vmem>>, vector<1x1x4x8xf32>
    %269 = vector.shape_cast %268 : vector<1x1x4x8xf32> to vector<4x8xf32>
    %270 = vector.shape_cast %261 : vector<4x8xf32> to vector<1x1x4x8xf32>
    tpu.vector_store %arg13[%c0_182, %c3_183, %c0_184, %c0_185], %270 {strides = array<i32>} : memref<1x4x4x8xf32, #tpu.memory_space<vmem>>, vector<1x1x4x8xf32>,
    return
  }
  func.func @transform_0(%arg0: i32) -> (i32, i32) {
    %c0_i32 = arith.constant 0 : i32
    %c0_i32_0 = arith.constant 0 : i32
    %c0_i32_1 = arith.constant 0 : i32
    return %c0_i32, %c0_i32_0 : i32, i32
  }
  func.func @transform_1(%arg0: i32) -> (i32, i32, i32) {
    %c0_i32 = arith.constant 0 : i32
    %c0_i32_0 = arith.constant 0 : i32
    %c0_i32_1 = arith.constant 0 : i32
    return %arg0, %c0_i32, %c0_i32_0 : i32, i32, i32
  }
  func.func @transform_2(%arg0: i32) -> (i32, i32, i32) {
    %c0_i32 = arith.constant 0 : i32
    %c0_i32_0 = arith.constant 0 : i32
    %c0_i32_1 = arith.constant 0 : i32
    return %arg0, %c0_i32, %c0_i32_0 : i32, i32, i32
  }
  func.func @transform_3(%arg0: i32) -> (i32, i32, i32) {
    %c0_i32 = arith.constant 0 : i32
    %c0_i32_0 = arith.constant 0 : i32
    %c0_i32_1 = arith.constant 0 : i32
    return %arg0, %c0_i32, %c0_i32_0 : i32, i32, i32
  }
  func.func @transform_4(%arg0: i32) -> (i32, i32, i32) {
    %c0_i32 = arith.constant 0 : i32
    %c0_i32_0 = arith.constant 0 : i32
    %c0_i32_1 = arith.constant 0 : i32
    %c0_i32_2 = arith.constant 0 : i32
    return %c0_i32, %c0_i32_0, %c0_i32_1 : i32, i32, i32
  }
  func.func @transform_5(%arg0: i32) -> (i32, i32, i32) {
    %c0_i32 = arith.constant 0 : i32
    %c0_i32_0 = arith.constant 0 : i32
    %c0_i32_1 = arith.constant 0 : i32
    %c0_i32_2 = arith.constant 0 : i32
    return %c0_i32, %c0_i32_0, %c0_i32_1 : i32, i32, i32
  }
  func.func @transform_6(%arg0: i32) -> (i32, i32, i32) {
    %c0_i32 = arith.constant 0 : i32
    %c0_i32_0 = arith.constant 0 : i32
    %c0_i32_1 = arith.constant 0 : i32
    %c0_i32_2 = arith.constant 0 : i32
    return %c0_i32, %c0_i32_0, %c0_i32_1 : i32, i32, i32
  }
  func.func @transform_7(%arg0: i32) -> (i32, i32, i32) {
    %c0_i32 = arith.constant 0 : i32
    %c0_i32_0 = arith.constant 0 : i32
    %c0_i32_1 = arith.constant 0 : i32
    %c0_i32_2 = arith.constant 0 : i32
    return %c0_i32, %c0_i32_0, %c0_i32_1 : i32, i32, i32
  }
  func.func @transform_8(%arg0: i32) -> (i32, i32, i32) {
    %c0_i32 = arith.constant 0 : i32
    %c0_i32_0 = arith.constant 0 : i32
    %c0_i32_1 = arith.constant 0 : i32
    %c0_i32_2 = arith.constant 0 : i32
    return %c0_i32, %c0_i32_0, %c0_i32_1 : i32, i32, i32
  }
  func.func @transform_9(%arg0: i32) -> (i32, i32, i32) {
    %c0_i32 = arith.constant 0 : i32
    %c0_i32_0 = arith.constant 0 : i32
    %c0_i32_1 = arith.constant 0 : i32
    %c0_i32_2 = arith.constant 0 : i32
    return %c0_i32, %c0_i32_0, %c0_i32_1 : i32, i32, i32
  }
  func.func @transform_10(%arg0: i32) -> (i32, i32, i32, i32) {
    %c0_i32 = arith.constant 0 : i32
    %c0_i32_0 = arith.constant 0 : i32
    %c0_i32_1 = arith.constant 0 : i32
    %c0_i32_2 = arith.constant 0 : i32
    return %arg0, %c0_i32, %c0_i32_0, %c0_i32_1 : i32, i32, i32, i32
  }
  func.func @transform_11(%arg0: i32) -> (i32, i32, i32, i32) {
    %c0_i32 = arith.constant 0 : i32
    %c0_i32_0 = arith.constant 0 : i32
    %c0_i32_1 = arith.constant 0 : i32
    %c0_i32_2 = arith.constant 0 : i32
    return %arg0, %c0_i32, %c0_i32_0, %c0_i32_1 : i32, i32, i32, i32
  }
  func.func @transform_12(%arg0: i32) -> (i32, i32, i32, i32) {
    %c0_i32 = arith.constant 0 : i32
    %c0_i32_0 = arith.constant 0 : i32
    %c0_i32_1 = arith.constant 0 : i32
    %c0_i32_2 = arith.constant 0 : i32
    return %arg0, %c0_i32, %c0_i32_0, %c0_i32_1 : i32, i32, i32, i32
  }
}

</mosaic_0001>

<bundles_post_ra>
// kernel: tpu_custom_call.1
= control target key start
LH: loop header
LB: loop body
LE: loop exit
PB: predicated region body
PF: predicated region fallthrough
CT: control target
= control target key end

     0   :  { %s5020_s0 = inlined_call_operand.vmem [shape: f32[4,8], index: 0, kind: input, shape index: {}]   ;;  %s5021_s1 = inlined_call_operand.vmem [shape: f32[2,8,32], index: 1, kind: input, shape index: {}]   ;;  %s5022_s2 = inlined_call_operand.vmem [shape: f32[2,8,32], index: 2, kind: input, shape index: {}]   ;;  %s5023_s3 = inlined_call_operand.vmem [shape: f32[2,8,32], index: 3, kind: input, shape index: {}]   ;;  %s5024_s4 = inlined_call_operand.vmem [shape: f32[4,32,8], index: 4, kind: input, shape index: {}]   ;;  %s5025_s5 = inlined_call_operand.vmem [shape: f32[4,1,8], index: 5, kind: input, shape index: {}]   ;;  %s5026_s6 = inlined_call_operand.vmem [shape: f32[4,32,8], index: 6, kind: input, shape index: {}]   ;;  %s5027_s7 = inlined_call_operand.vmem [shape: f32[4,1,8], index: 7, kind: input, shape index: {}]   ;;  %s5028_s8 = inlined_call_operand.vmem [shape: f32[4,32,8], index: 8, kind: input, shape index: {}]   ;;  %s5029_s9 = inlined_call_operand.vmem [shape: f32[4,1,8], index: 9, kind: input, shape index: {}]   ;;  %s5030_s10 = inlined_call_operand.vmem [shape: f32[2,4,8,4], index: 10, kind: output, shape index: {0}]   ;;  %s5031_s11 = inlined_call_operand.hbm [shape: f32[2,4,4,4], index: 11, kind: output, shape index: {1}]   ;;  %s5032_s12 = inlined_call_operand.hbm [shape: f32[2,4,4,8], index: 12, kind: output, shape index: {2}]  }
   0x1   :  { %5035 = sst [smem:[#allocation8_spill]] %s5020_s0 }
   0x2   :  { %5036 = sst [smem:[#allocation9_spill]] %s5021_s1 }
   0x3   :  { %5037 = sst [smem:[#allocation10_spill]] %s5022_s2 }
   0x4   :  { %5038 = sst [smem:[#allocation11_spill]] %s5023_s3 }
   0x5   :  { %5039 = sst [smem:[#allocation12_spill]] %s5024_s4 }
   0x6   :  { %18 = vsyncpa [#allocation3], 0 }
   0x7   :  { %20 = vsyncpa [#allocation3 + $0x1], 0 }
   0x8   :  { %21 = vsyncpa [#allocation5], 0 }
   0x9   :  { %23 = vsyncpa [#allocation5 + $0x1], 0  ;;  %s4389_s21 = smov 0   ;;  %s4391_s22 = smov 0  }
   0xa   :  { %s4393_s23 = smov 0   ;;  %s4395_s24 = smov 0  }
   0xb LB: > { %s4410_s25 = sadd.s32 4294967295, %s4315_s24   ;;  %s3556_s26 = sadd.s32 4294967294, %s4315_s24   ;;  %s4315_s24 = sphi %s4395_s24, %s5052_s24   ;;  %s4311_s23 = sphi %s4393_s23, %s5051_s23   ;;  %s4307_s22 = sphi %s4391_s22, %s5050_s22   ;;  %s4303_s21 = sphi %s4389_s21, %s5049_s21  }
   0xc   : > { %s4414_s27 = sadd.s32 1, %s4315_s24   ;;  %s287_s28 = sadd.s32 1, %s4311_s23 }
   0xd   : > { %s284_s29 = ssub.s32 %s4315_s24, %s4414_s27  ;;  %p297_p0 = scmp.ne.s32.totalorder %s4311_s23, %s4307_s22 }
   0xe   : > { %p285_p1 = scmp.eq.s32.totalorder %s284_s29, 0  ;;  %p298_p2 = scmp.eq.s32.totalorder %s4410_s25, 1 }
   0xf   : > { %p303_p3 = scmp.ne.s32.totalorder %s4307_s22, %s4303_s21  ;;  %p304_p4 = scmp.eq.s32.totalorder %s3556_s26, 1 }
  0x10   : > { %s4425_s30 = scalar_select %p285_p1, %s4311_s23, %s287_s28  }
  0x11   : > { %p4427_p5 = por %p298_p2, %p297_p0  ;;  %p4431_p6 = por %p304_p4, %p303_p3 }
  0x12   : > { %p3559_p7 = scmp.ge.s32.totalorder %s4315_s24, 1  ;;  %p390_p8 = scmp.lt.s32.totalorder %s4315_s24, 3 }
  0x14   : > { %p391_p9 = pnand %p3559_p7, %p390_p8 }
  0x15   : > { %v555_v0 = vld [vmem:[%s5026_s6] sm:$0xff] (!%p391_p9)  ;;  %v556_v1 = vld [vmem:[%s5026_s6 + $0x8] sm:$0xff] (!%p391_p9)  ;;  %v557_v2 = vld [vmem:[%s5026_s6 + $0x10] sm:$0xff] (!%p391_p9)  ;;  %v4317_v3 = vmov (!%p391_p9), 0.0|0.0   ;;  %s5042_s4 = sld [smem:[#allocation12_spill]] (!%p391_p9)  ;;  %p449_p10 = scmp.lt.s32.totalorder (!%p391_p9), %s4410_s25, 1 }
  0x16   : > { %394 = sbr.rel (%p391_p9) target bundleno = 4124 (0x101c), region = 60  ;;  %4058 = vmatprep.subr.bf16.mxu1 (!%p391_p9), %v4317_v3  ;;  %v4059_v4 = vpack.c.bf16 (!%p391_p9), %v556_v1, %v555_v0  ;;  %v558_v5 = vld [vmem:[%s5026_s6 + $0x18] sm:$0xff] (!%p391_p9)  ;;  %4052 = vmatprep.subr.bf16.mxu0 (!%p391_p9), %v4317_v3  ;;  %vm4318_vm0 = vmmov (!%p391_p9), 0   ;;  %v4319_v9 = vmov (!%p391_p9), 0.0   ;;  %s5043_s2 = sld [smem:[#allocation10_spill]] (!%p391_p9)  ;;  %vm481_vm1 = vcmask (!%p391_p9), 261120  }
  0x17   : > { %3819 = vmatprep.mubr.msk.f32.mxu1 (!%p391_p9), %vm4318_vm0, %v4319_v9  ;;  %3808 = vmatprep.mubr.msk.f32.mxu0 (!%p391_p9), %vm4318_vm0, %v4319_v9  ;;  %v4062_v12 = vpack.c.bf16 (!%p391_p9), %v558_v5, %v557_v2  ;;  %s5044_s1 = sld [smem:[#allocation9_spill]] (!%p391_p9)  ;;  %v639_v16 = vld [vmem:[%s5028_s8] sm:$0xff] (!%p391_p9)  ;;  %v640_v17 = vld [vmem:[%s5028_s8 + $0x8] sm:$0xff] (!%p391_p9)  ;;  %v641_v18 = vld [vmem:[%s5028_s8 + $0x10] sm:$0xff] (!%p391_p9)  ;;  %s5045_s3 = sld [smem:[#allocation11_spill]] (!%p391_p9)  ;;  %vm723_vm2 = vcmask (!%p391_p9), 64512  }
  0x18   : > { %4060 = vmatpush3.bf16.msra.mxu1 (!%p391_p9), %v4059_v4  ;;  %v4065_v19 = vpack.c.bf16 (!%p391_p9), %v640_v17, %v639_v16  ;;  %v642_v20 = vld [vmem:[%s5028_s8 + $0x18] sm:$0xff] (!%p391_p9)  ;;  %v3569_v23 = vld [vmem:[%s5027_s7] ss:$0 sm:$0xff] (!%p391_p9)  ;;  %s5046_s0 = sld [smem:[#allocation8_spill]] (!%p391_p9)  ;;  %vm1113_vm3 = vcmask (!%p391_p9), 60416   ;;  %v3590_v60 = vld [vmem:[%s5026_s6 + $0x28] sm:$0xff] (!%p391_p9) }
  0x19   : > { %4061 = vmatprep.subr.bf16.mxu1 (!%p391_p9), %v4317_v3  ;;  %v4068_v21 = vpack.c.bf16 (!%p391_p9), %v642_v20, %v641_v18  ;;  %v3567_v24 = vld [vmem:[%s5025_s5] ss:$0 sm:$0xff] (!%p391_p9)  ;;  %v3591_v0 = vld [vmem:[%s5026_s6 + $0x30] sm:$0xff] (!%p391_p9)  ;;  %v3592_v1 = vld [vmem:[%s5026_s6 + $0x38] sm:$0xff] (!%p391_p9)  ;;  %vm1028_vm4 = vcmask (!%p391_p9), 27648   ;;  %vm943_vm5 = vcmask (!%p391_p9), 31744  }
  0x1a   : > { %v3571_v34 = vld [vmem:[%s5029_s9] ss:$0 sm:$0xff] (!%p391_p9)  ;;  %v4080_v2 = vpack.c.bf16 (!%p391_p9), %v3592_v1, %v3591_v0  ;;  %v3594_v17 = vld [vmem:[%s5027_s7 + $0x1] ss:$0 sm:$0xff] (!%p391_p9)  ;;  %v3630_v1 = vld [vmem:[%s5028_s8 + $0x48] sm:$0xff] (!%p391_p9)  ;;  %s5034_s19 = sshll.u32 (!%p391_p9), %s4410_s25, 8 }
  0x1b   : > { %v470_v6 = vld [vmem:[%s5042_s4] sm:$0xff] (!%p391_p9)  ;;  %v471_v7 = vld [vmem:[%s5042_s4 + $0x8] sm:$0xff] (!%p391_p9)  ;;  %v472_v10 = vld [vmem:[%s5042_s4 + $0x10] sm:$0xff] (!%p391_p9) }
  0x1c   : > { %v4053_v8 = vpack.c.bf16 (!%p391_p9), %v471_v7, %v470_v6  ;;  %v473_v11 = vld [vmem:[%s5042_s4 + $0x18] sm:$0xff] (!%p391_p9)  ;;  %4063 = vmatpush3.bf16.msra.mxu1 (!%p391_p9), %v4062_v12  ;;  %v3582_v52 = vld [vmem:[%s5042_s4 + $0x20] sm:$0xff] (!%p391_p9)  ;;  %v3583_v53 = vld [vmem:[%s5042_s4 + $0x28] sm:$0xff] (!%p391_p9) }
  0x1d   : > { %s4469_s28 = scalar_select %p449_p10, %s4410_s25, 1  ;;  %v4056_v13 = vpack.c.bf16 %v473_v11, %v472_v10  ;;  %3833 = vmatprep.subr.mxu1 %v4319_v9  ;;  %v4071_v54 = vpack.c.bf16 %v3583_v53, %v3582_v52  ;;  %v3584_v55 = vld [vmem:[%s5042_s4 + $0x30] sm:$0xff]  ;;  %v3585_v56 = vld [vmem:[%s5042_s4 + $0x38] sm:$0xff]  ;;  %v3589_v59 = vld [vmem:[%s5026_s6 + $0x20] sm:$0xff] }
  0x1e   : > { %4054 = vmatpush3.bf16.msra.mxu0 %v4053_v8  ;;  %v4526_v28 = vld [vmem:[%s5046_s0] sm:$0xf]  ;;  %v4074_v57 = vpack.c.bf16 %v3585_v56, %v3584_v55  ;;  %v4077_v62 = vpack.c.bf16 %v3590_v60, %v3589_v59  ;;  %v3597_v7 = vld [vmem:[%s5028_s8 + $0x28] sm:$0xff]  ;;  %v3598_v8 = vld [vmem:[%s5028_s8 + $0x30] sm:$0xff]  ;;  %s4320_s0 = smov [#allocation2]  }
  0x1f   : > { %s3562_s29 = sshll.u32 %s4469_s28, 3  ;;  %4055 = vmatprep.subr.bf16.mxu0 %v4317_v3  ;;  %v3596_v6 = vld [vmem:[%s5028_s8 + $0x20] sm:$0xff]  ;;  %v3599_v11 = vld [vmem:[%s5028_s8 + $0x38] sm:$0xff]  ;;  %v3623_v55 = vld [vmem:[%s5026_s6 + $0x48] sm:$0xff] }
  0x20   : > { %s456_s17 = scalar_lea.vmem %s5043_s2, %s3562_s29  ;;  %s452_s20 = scalar_lea.vmem %s5044_s1, %s3562_s29  ;;  %v4083_v10 = vpack.c.bf16 %v3597_v7, %v3596_v6  ;;  %v4086_v12 = vpack.c.bf16 %v3599_v11, %v3598_v8  ;;  %v3587_v18 = vld [vmem:[%s5025_s5 + $0x1] ss:$0 sm:$0xff]  ;;  %v3624_v59 = vld [vmem:[%s5026_s6 + $0x50] sm:$0xff]  ;;  %v3625_v60 = vld [vmem:[%s5026_s6 + $0x58] sm:$0xff] }
  0x21   : > { %v4477_v14 = vld [vmem:[%s456_s17] sm:$0xff]  ;;  %s460_s15 = scalar_lea.vmem %s5045_s3, %s3562_s29  ;;  %s4621_s17 = sand.u32 1, %s4307_s22  }
  0x22   : > { %4057 = vmatpush3.bf16.msra.mxu0 %v4056_v13  ;;  %v4482_v15 = vld [vmem:[%s452_s20] sm:$0xff]  ;;  %3820 = vmatmul.mubr.msk.f32.vlgmr.msra.gmra.mrb[0].mxu1 %vm481_vm1, %v4477_v14  ;;  %s5033_s18 = sshll.u32 %s4621_s17, 4  ;;  %s3376_s1 = scalar_lea.sflag [#allocation3], %s4621_s17 }
  0x23   : > { %4064 = vmatprep.subr.bf16.mxu0 %v4317_v3  ;;  %3835 = vmatprep.mubr.msk.f32.mxu1 %vm4318_vm0, %v4319_v9  ;;  %v4510_v22 = vld [vmem:[%s460_s15] sm:$0xff]  ;;  %s4626_s2 = scalar_lea.vmem [#allocation4], %s5033_s18  ;;  %s5047_s18 = sshll.u32 %s4621_s17, 4 }
  0x24   : > { %v3629_v0 = vld [vmem:[%s5028_s8 + $0x40] sm:$0xff]  ;;  %s4898_s26 = scalar_lea.vmem [#allocation2], %s5047_s18  ;;  %s3689_s15 = sshll.u32 %s4469_s28, 5 }
  0x25   : > { %3809 = vmatmul.mubr.msk.f32.vlgmr.msra.gmra.mrb[0].mxu0 %vm481_vm1, %v4482_v15  ;;  %v3620_v11 = vld [vmem:[%s5025_s5 + $0x2] ss:$0 sm:$0xff]  ;;  %s4909_s29 = scalar_lea.vmem %s5030_s10, %s3689_s15  ;;  %s3397_s28 = sshll.u32 %s4898_s26, 4  ;;  %s4922_s28 = int_to_ptr.vmem [resolvable:$true] %s3397_s28 }
  0x26   : > { %3830 = vmatprep.mubr.msk.f32.mxu0 %vm4318_vm0, %v4319_v9  ;;  %4066 = vmatpush3.bf16.msra.mxu0 %v4065_v19  ;;  %s4929_s15 = scalar_lea.hbm %s5031_s11, %s5034_s19  ;;  %s4221_s16 = scalar_lea.vmem %s4922_s28, 256 }
  0x27   : > { %4067 = vmatprep.subr.bf16.mxu0 %v4317_v3  ;;  %p4222_p11 = scmp.ne.s32.totalorder %s4922_s28, %s4221_s16  ;;  %s4225_s3 = sshll.u32 %s4320_s0, 4  ;;  %s4226_s3 = int_to_ptr.vmem [resolvable:$false] %s4225_s3 }
  0x28   : > { %p4228_p0 = scmp.lt.s32.totalorder %s4922_s28, %s4226_s3 }
  0x29   : > { %p4223_p12 = pnand %p4222_p11, %p4427_p5 }
  0x2a   : > { %4069 = vmatpush3.bf16.msra.mxu0 %v4068_v21 }
  0x2b   : > { %3843 = vmatprep.subr.mxu0 %v4319_v9  ;;  %p4224_p13 = pneg %p4223_p12 }
  0x2d   : > { %3831 = vmatmul.mubr.msk.f32.vlgmr.msra.gmra.mrb[2].mxu0 %vm481_vm1, %v4510_v22 }
  0x2e   : > { %3845 = vmatprep.mubr.msk.f32.mxu0 %vm4318_vm0, %v4319_v9 }
  0xf5   : > { %v635_v25 = vpop.f32.mrb[0].mxu1 }
  0xf6   : > { %v636_v26 = vadd.f32 %v3569_v23, %v635_v25  ;;  %v3821_v27 = vpop.f32.mrb[1].mxu1 }
  0xf8   : > { %v551_v29 = vpop.f32.mrb[0].mxu0  ;;  %3834 = vmatpush3.msra.mxu1 %v636_v26 }
  0xf9   : > { %v552_v30 = vadd.f32 %v3567_v24, %v551_v29  ;;  %v3810_v31 = vpop.f32.mrb[1].mxu0  ;;  %3836 = vmatmul.mubr.msk.f32.vlgmr.msra.gmra.mrb[2].mxu1 %vm723_vm2, %v4526_v28  ;;  %3838 = vmatprep.subr.mxu1 %v4319_v9 }
  0xfa   : > { %3840 = vmatprep.mubr.msk.f32.mxu1 %vm4318_vm0, %v4319_v9 }
  0xfb   : > { %3839 = vmatpush3.msra.mxu1 %v552_v30 }
  0xfc   : > { %3848 = vmatprep.subr.mxu1 %v4319_v9 }
  0xfd   : > { %3841 = vmatmul.mubr.msk.f32.vlgmr.msra.gmra.mrb[4].mxu1 %vm723_vm2, %v4526_v28 }
  0xfe   : > { %3850 = vmatprep.mubr.msk.f32.mxu1 %vm4318_vm0, %v4319_v9 }
 0x100   : > { %v719_v32 = vpop.f32.mrb[2].mxu0 }
 0x101   : > { %v3832_v33 = vpop.f32.mrb[3].mxu0  ;;  %v720_v37 = vadd.f32 %v3571_v34, %v719_v32 }
 0x1cc   : > { %v793_v35 = vpop.f32.mrb[2].mxu1 }
 0x1cd   : > { %v3837_v36 = vpop.f32.mrb[3].mxu1  ;;  %3844 = vmatpush3.xpose.msk.msra.mxu0 %vm723_vm2, %v793_v35  ;;  %3849 = vmatpush3.xpose.msk.msra.mxu1 %vm723_vm2, %v793_v35 }
 0x1ce   : > { %3853 = vmatprep.subr.mxu0 %v4319_v9  ;;  %3858 = vmatprep.subr.mxu1 %v4319_v9 }
 0x1d0   : > { %3846 = vmatmul.mubr.msk.f32.vlgmr.msra.gmra.mrb[4].mxu0 %vm723_vm2, %v552_v30  ;;  %v863_v38 = vpop.f32.mrb[4].mxu1 }
 0x1d1   : > { %3854 = vmatpush3.xpose.msk.msra.mxu0 %vm723_vm2, %v636_v26  ;;  %v3842_v39 = vpop.f32.mrb[5].mxu1  ;;  %3851 = vmatmul.mubr.msk.f32.vlgmr.msra.gmra.mrb[6].mxu1 %vm723_vm2, %v863_v38  ;;  %v3601_v26 = vld [vmem:[%s5029_s9 + $0x1] ss:$0 sm:$0xff] }
 0x1d2   : > { %3855 = vmatprep.mubr.msk.f32.mxu0 %vm4318_vm0, %v4319_v9  ;;  %3859 = vmatpush3.msra.mxu1 %v720_v37 }
 0x1d3   : > { %3860 = vmatprep.mubr.msk.f32.mxu1 %vm4318_vm0, %v4319_v9  ;;  %4076 = vmatprep.subr.bf16.mxu1 %v4317_v3 }
 0x1d4   : > { %3856 = vmatmul.mubr.msk.f32.vlgmr.msra.gmra.mrb[6].mxu0 %vm723_vm2, %v863_v38  ;;  %4070 = vmatprep.subr.bf16.mxu0 %v4317_v3 }
 0x1d5   : > { %3871 = vmatprep.mubr.msk.f32.mxu0 %vm4318_vm0, %v4319_v9  ;;  %4072 = vmatpush3.bf16.msra.mxu0 %v4071_v54  ;;  %v3622_v54 = vld [vmem:[%s5026_s6 + $0x40] sm:$0xff] }
 0x1d6   : > { %4073 = vmatprep.subr.bf16.mxu0 %v4317_v3 }
 0x1d9   : > { %4075 = vmatpush3.bf16.msra.mxu0 %v4074_v57  ;;  %v4095_v57 = vpack.c.bf16 %v3623_v55, %v3622_v54 }
 0x1da   : > { %4082 = vmatprep.subr.bf16.mxu0 %v4317_v3 }
 0x1dc   : > { %3872 = vmatmul.mubr.msk.f32.vlgmr.msra.gmra.mrb[8].mxu0 %vm481_vm1, %v4482_v15 }
 0x1dd   : > { %3893 = vmatprep.mubr.msk.f32.mxu0 %vm4318_vm0, %v4319_v9  ;;  %4084 = vmatpush3.bf16.msra.mxu0 %v4083_v10  ;;  %v3627_v10 = vld [vmem:[%s5027_s7 + $0x2] ss:$0 sm:$0xff] }
 0x1de   : > { %4085 = vmatprep.subr.bf16.mxu0 %v4317_v3 }
 0x1e1   : > { %4087 = vmatpush3.bf16.msra.mxu0 %v4086_v12 }
 0x1e2   : > { %3906 = vmatprep.subr.mxu0 %v4319_v9 }
 0x1e4   : > { %3894 = vmatmul.mubr.msk.f32.vlgmr.msra.gmra.mrb[10].mxu0 %vm481_vm1, %v4510_v22 }
 0x1e5   : > { %3908 = vmatprep.mubr.msk.f32.mxu0 %vm4318_vm0, %v4319_v9 }
 0x2a3   : > { %v4557_v40 = vpop.f32.mrb[4].mxu0 }
 0x2a4   : > { %v3847_v41 = vpop.f32.mrb[5].mxu0  ;;  %v4559_v42 = vpop.f32.mrb[6].mxu1 }
 0x2a5   : > { %v3852_v43 = vpop.f32.mrb[7].mxu1 }
 0x2a7   : > { %v1109_v44 = vpop.f32.mrb[6].mxu0 }
 0x2a8   : > { %v3857_v45 = vpop.f32.mrb[7].mxu0  ;;  %v1114_v46 = vsel %vm1113_vm3, %v1109_v44, -inf }
 0x2a9   : > { %1115 = vmax.xlane.f32.xlu0 %v1114_v46 }
 0x2af   : > { %v1280_v4 = vpop.f32.mrb[8].mxu0 }
 0x2b0   : > { %v3873_v5 = vpop.f32.mrb[9].mxu0  ;;  %v1281_v23 = vadd.f32 %v3587_v18, %v1280_v4  ;;  %v4101_v4 = vpack.c.bf16 %v3630_v1, %v3629_v0 }
 0x2b1   : > { %v3632_v5 = vld [vmem:[%s5028_s8 + $0x58] sm:$0xff] }
 0x2b7   : > { %v1446_v24 = vpop.f32.mrb[10].mxu0 }
 0x2b8   : > { %v3895_v25 = vpop.f32.mrb[11].mxu0  ;;  %v1447_v30 = vadd.f32 %v3601_v26, %v1446_v24 }
 0x336   : > { %v1116_v47 = vpop.xlane.xlu0 %1115 }
 0x337   : > { %v1117_v48 = vsub.f32 %v1109_v44, %v1116_v47  ;;  %v3615_v47 = vld [vmem:[%s5042_s4 + $0x40] sm:$0xff] }
 0x339   : > { %v1118_v49 = vmul.f32 1.442695, %v1117_v48  ;;  %v3616_v48 = vld [vmem:[%s5042_s4 + $0x48] sm:$0xff] }
 0x33b   : > { %4173 = vpow2.f32 %v1118_v49  ;;  %v4089_v49 = vpack.c.bf16 %v3616_v48, %v3615_v47  ;;  %v3650_v47 = vld [vmem:[%s5042_s4 + $0x70] sm:$0xff]  ;;  %v3651_v48 = vld [vmem:[%s5042_s4 + $0x78] sm:$0xff] }
 0x345   : > { %v4174_v50 = vpop.eup %4173 }
 0x346   : > { %v1120_v51 = vsel %vm1113_vm3, %v4174_v50, 0.0 }
 0x347   : > { %1121 = vadd.xlane.f32.xlu0 %v1120_v51  ;;  %v3618_v51 = vld [vmem:[%s5042_s4 + $0x58] sm:$0xff] }
 0x3d4   : > { %v1122_v58 = vpop.xlane.xlu0 %1121 }
 0x3d5   : > { %4175 = vrcp.f32 %v1122_v58 }
 0x3df   : > { %v4176_v61 = vpop.eup %4175 }
 0x3e0   : > { %v1124_v63 = vmul.f32 %v4176_v61, %v4174_v50  ;;  %v3617_v50 = vld [vmem:[%s5042_s4 + $0x50] sm:$0xff]  ;;  %v4098_v61 = vpack.c.bf16 %v3625_v60, %v3624_v59  ;;  %v3662_v60 = vld [vmem:[%s5028_s8 + $0x60] sm:$0xff] }
 0x3e1   : > { %v4092_v52 = vpack.c.bf16 %v3618_v51, %v3617_v50  ;;  %v3655_v51 = vld [vmem:[%s5026_s6 + $0x60] sm:$0xff] }
 0x3e2   : > { %3861 = vmatmul.mubr.msk.f32.vlgmr.msra.gmra.mrb[8].mxu1 %vm723_vm2, %v1124_v63 }
 0x3e3   : > { %4078 = vmatpush3.bf16.msra.mxu1 %v4077_v62  ;;  %3882 = vmatprep.mubr.msk.f32.mxu1 %vm4318_vm0, %v4319_v9 }
 0x3e4   : > { %4079 = vmatprep.subr.bf16.mxu1 %v4317_v3 }
 0x3e7   : > { %4081 = vmatpush3.bf16.msra.mxu1 %v4080_v2  ;;  %v3631_v2 = vld [vmem:[%s5028_s8 + $0x50] sm:$0xff] }
 0x3e8   : > { %3896 = vmatprep.subr.mxu1 %v4319_v9  ;;  %v4104_v6 = vpack.c.bf16 %v3632_v5, %v3631_v2 }
 0x3ea   : > { %3883 = vmatmul.mubr.msk.f32.vlgmr.msra.gmra.mrb[10].mxu1 %vm481_vm1, %v4477_v14 }
 0x3eb   : > { %3898 = vmatprep.mubr.msk.f32.mxu1 %vm4318_vm0, %v4319_v9 }
 0x4b5   : > { %v1194_v13 = vpop.f32.mrb[8].mxu1 }
 0x4b6   : > { %1200 = vst.msk [vmem:[%s4626_s2] sm:$0xf] %vm1113_vm3, %v1194_v13  ;;  %v3862_v16 = vpop.f32.mrb[9].mxu1 }
 0x4bd   : > { %v1363_v19 = vpop.f32.mrb[10].mxu1 }
 0x4be   : > { %v1364_v20 = vadd.f32 %v3594_v17, %v1363_v19  ;;  %v3884_v21 = vpop.f32.mrb[11].mxu1 }
 0x4c0   : > { %3897 = vmatpush3.msra.mxu1 %v1364_v20 }
 0x4c1   : > { %3899 = vmatmul.mubr.msk.f32.vlgmr.msra.gmra.mrb[12].mxu1 %vm723_vm2, %v4526_v28  ;;  %3901 = vmatprep.subr.mxu1 %v4319_v9 }
 0x4c2   : > { %3902 = vmatpush3.msra.mxu1 %v1281_v23  ;;  %3903 = vmatprep.mubr.msk.f32.mxu1 %vm4318_vm0, %v4319_v9 }
 0x4c3   : > { %3911 = vmatprep.subr.mxu1 %v4319_v9 }
 0x4c5   : > { %3904 = vmatmul.mubr.msk.f32.vlgmr.msra.gmra.mrb[14].mxu1 %vm723_vm2, %v4526_v28 }
 0x4c6   : > { %3913 = vmatprep.mubr.msk.f32.mxu1 %vm4318_vm0, %v4319_v9 }
 0x594   : > { %v1516_v27 = vpop.f32.mrb[12].mxu1 }
 0x595   : > { %v3900_v29 = vpop.f32.mrb[13].mxu1  ;;  %3907 = vmatpush3.xpose.msk.msra.mxu0 %vm723_vm2, %v1516_v27  ;;  %3912 = vmatpush3.xpose.msk.msra.mxu1 %vm723_vm2, %v1516_v27 }
 0x596   : > { %3916 = vmatprep.subr.mxu0 %v4319_v9  ;;  %3921 = vmatprep.subr.mxu1 %v4319_v9 }
 0x598   : > { %3909 = vmatmul.mubr.msk.f32.vlgmr.msra.gmra.mrb[12].mxu0 %vm723_vm2, %v1281_v23  ;;  %v1586_v31 = vpop.f32.mrb[14].mxu1 }
 0x599   : > { %3917 = vmatpush3.xpose.msk.msra.mxu0 %vm723_vm2, %v1364_v20  ;;  %v3905_v32 = vpop.f32.mrb[15].mxu1  ;;  %3914 = vmatmul.mubr.msk.f32.vlgmr.msra.gmra.mrb[16].mxu1 %vm723_vm2, %v1586_v31  ;;  %v3634_v20 = vld [vmem:[%s5029_s9 + $0x2] ss:$0 sm:$0xff] }
 0x59a   : > { %3918 = vmatprep.mubr.msk.f32.mxu0 %vm4318_vm0, %v4319_v9  ;;  %3922 = vmatpush3.msra.mxu1 %v1447_v30 }
 0x59b   : > { %3923 = vmatprep.mubr.msk.f32.mxu1 %vm4318_vm0, %v4319_v9  ;;  %4094 = vmatprep.subr.bf16.mxu1 %v4317_v3 }
 0x59c   : > { %3919 = vmatmul.mubr.msk.f32.vlgmr.msra.gmra.mrb[14].mxu0 %vm723_vm2, %v1586_v31  ;;  %4088 = vmatprep.subr.bf16.mxu0 %v4317_v3 }
 0x59d   : > { %3934 = vmatprep.mubr.msk.f32.mxu0 %vm4318_vm0, %v4319_v9  ;;  %4090 = vmatpush3.bf16.msra.mxu0 %v4089_v49  ;;  %v4110_v49 = vpack.c.bf16 %v3651_v48, %v3650_v47 }
 0x59e   : > { %4091 = vmatprep.subr.bf16.mxu0 %v4317_v3 }
 0x5a1   : > { %4093 = vmatpush3.bf16.msra.mxu0 %v4092_v52  ;;  %v3656_v52 = vld [vmem:[%s5026_s6 + $0x68] sm:$0xff] }
 0x5a2   : > { %4100 = vmatprep.subr.bf16.mxu0 %v4317_v3  ;;  %v4113_v54 = vpack.c.bf16 %v3656_v52, %v3655_v51 }
 0x5a4   : > { %3935 = vmatmul.mubr.msk.f32.vlgmr.msra.gmra.mrb[16].mxu0 %vm481_vm1, %v4482_v15 }
 0x5a5   : > { %3956 = vmatprep.mubr.msk.f32.mxu0 %vm4318_vm0, %v4319_v9  ;;  %4102 = vmatpush3.bf16.msra.mxu0 %v4101_v4  ;;  %v3660_v4 = vld [vmem:[%s5027_s7 + $0x3] ss:$0 sm:$0xff] }
 0x5a6   : > { %4103 = vmatprep.subr.bf16.mxu0 %v4317_v3 }
 0x5a9   : > { %4105 = vmatpush3.bf16.msra.mxu0 %v4104_v6 }
 0x5aa   : > { %3969 = vmatprep.subr.mxu0 %v4319_v9 }
 0x5ac   : > { %3957 = vmatmul.mubr.msk.f32.vlgmr.msra.gmra.mrb[18].mxu0 %vm481_vm1, %v4510_v22 }
 0x5ad   : > { %3971 = vmatprep.mubr.msk.f32.mxu0 %vm4318_vm0, %v4319_v9 }
 0x66b   : > { %v4665_v33 = vpop.f32.mrb[12].mxu0 }
 0x66c   : > { %v3910_v34 = vpop.f32.mrb[13].mxu0  ;;  %v4667_v35 = vpop.f32.mrb[16].mxu1 }
 0x66d   : > { %v3915_v36 = vpop.f32.mrb[17].mxu1 }
 0x66f   : > { %v1830_v37 = vpop.f32.mrb[14].mxu0 }
 0x670   : > { %v3920_v38 = vpop.f32.mrb[15].mxu0  ;;  %v1834_v39 = vsel %vm1113_vm3, %v1830_v37, -inf }
 0x671   : > { %1835 = vmax.xlane.f32.xlu1 %v1834_v39 }
 0x677   : > { %v2003_v62 = vpop.f32.mrb[16].mxu0 }
 0x678   : > { %v3936_v63 = vpop.f32.mrb[17].mxu0  ;;  %v2004_v17 = vadd.f32 %v3620_v11, %v2003_v62  ;;  %v3664_v62 = vld [vmem:[%s5028_s8 + $0x70] sm:$0xff] }
 0x67f   : > { %v2169_v18 = vpop.f32.mrb[18].mxu0 }
 0x680   : > { %v3958_v19 = vpop.f32.mrb[19].mxu0  ;;  %v2170_v24 = vadd.f32 %v3634_v20, %v2169_v18 }
 0x6fe   : > { %v1836_v41 = vpop.xlane.xlu1 %1835 }
 0x6ff   : > { %v1837_v43 = vsub.f32 %v1830_v37, %v1836_v41 }
 0x701   : > { %v1838_v44 = vmul.f32 1.442695, %v1837_v43 }
 0x703   : > { %4177 = vpow2.f32 %v1838_v44  ;;  %v3648_v44 = vld [vmem:[%s5042_s4 + $0x60] sm:$0xff] }
 0x70d   : > { %v4178_v45 = vpop.eup %4177 }
 0x70e   : > { %v1840_v46 = vsel %vm1113_vm3, %v4178_v45, 0.0 }
 0x70f   : > { %1841 = vadd.xlane.f32.xlu1 %v1840_v46 }
 0x79c   : > { %v1842_v53 = vpop.xlane.xlu1 %1841 }
 0x79d   : > { %4179 = vrcp.f32 %v1842_v53 }
 0x7a7   : > { %v4180_v56 = vpop.eup %4179 }
 0x7a8   : > { %v1844_v58 = vmul.f32 %v4180_v56, %v4178_v45  ;;  %v3649_v45 = vld [vmem:[%s5042_s4 + $0x68] sm:$0xff]  ;;  %v3658_v56 = vld [vmem:[%s5026_s6 + $0x78] sm:$0xff]  ;;  %s4227_s4 = scalar_lea.vmem %s4226_s3, 512 }
 0x7a9   : > { %v4107_v46 = vpack.c.bf16 %v3649_v45, %v3648_v44  ;;  %p4229_p1 = scmp.lt.s32.totalorder %s4227_s4, %s4221_s16 }
 0x7aa   : > { %3924 = vmatmul.mubr.msk.f32.vlgmr.msra.gmra.mrb[18].mxu1 %vm723_vm2, %v1844_v58 }
 0x7ab   : > { %4096 = vmatpush3.bf16.msra.mxu1 %v4095_v57  ;;  %3945 = vmatprep.mubr.msk.f32.mxu1 %vm4318_vm0, %v4319_v9  ;;  %p4230_p2 = por %p4229_p1, %p4228_p0 }
 0x7ac   : > { %4097 = vmatprep.subr.bf16.mxu1 %v4317_v3 }
 0x7ad   : > { %p4231_p3 = pnand %p4230_p2, %p4224_p13 }
 0x7af   : > { %4099 = vmatpush3.bf16.msra.mxu1 %v4098_v61  ;;  %v3663_v61 = vld [vmem:[%s5028_s8 + $0x68] sm:$0xff] }
 0x7b0   : > { %3959 = vmatprep.subr.mxu1 %v4319_v9  ;;  %v4119_v63 = vpack.c.bf16 %v3663_v61, %v3662_v60 }
 0x7b2   : > { %3946 = vmatmul.mubr.msk.f32.vlgmr.msra.gmra.mrb[20].mxu1 %vm481_vm1, %v4477_v14 }
 0x7b3   : > { %3961 = vmatprep.mubr.msk.f32.mxu1 %vm4318_vm0, %v4319_v9 }
 0x87d   : > { %v1914_v7 = vpop.f32.mrb[18].mxu1 }
 0x87e   : > { %3614 = vst.msk [vmem:[%s4626_s2 + $0x4] sm:$0xf] %vm1113_vm3, %v1914_v7  ;;  %v3925_v8 = vpop.f32.mrb[19].mxu1 }
 0x885   : > { %v2086_v12 = vpop.f32.mrb[20].mxu1 }
 0x886   : > { %v2087_v13 = vadd.f32 %v3627_v10, %v2086_v12  ;;  %v3947_v16 = vpop.f32.mrb[21].mxu1  ;;  %v3667_v12 = vld [vmem:[%s5029_s9 + $0x3] ss:$0 sm:$0xff] }
 0x888   : > { %3960 = vmatpush3.msra.mxu1 %v2087_v13 }
 0x889   : > { %3962 = vmatmul.mubr.msk.f32.vlgmr.msra.gmra.mrb[22].mxu1 %vm723_vm2, %v4526_v28  ;;  %3964 = vmatprep.subr.mxu1 %v4319_v9 }
 0x88a   : > { %3965 = vmatpush3.msra.mxu1 %v2004_v17  ;;  %3966 = vmatprep.mubr.msk.f32.mxu1 %vm4318_vm0, %v4319_v9 }
 0x88b   : > { %3974 = vmatprep.subr.mxu1 %v4319_v9 }
 0x88d   : > { %3967 = vmatmul.mubr.msk.f32.vlgmr.msra.gmra.mrb[24].mxu1 %vm723_vm2, %v4526_v28 }
 0x88e   : > { %3976 = vmatprep.mubr.msk.f32.mxu1 %vm4318_vm0, %v4319_v9 }
 0x95c   : > { %v2239_v21 = vpop.f32.mrb[22].mxu1 }
 0x95d   : > { %v3963_v23 = vpop.f32.mrb[23].mxu1  ;;  %3970 = vmatpush3.xpose.msk.msra.mxu0 %vm723_vm2, %v2239_v21  ;;  %3975 = vmatpush3.xpose.msk.msra.mxu1 %vm723_vm2, %v2239_v21 }
 0x95e   : > { %3979 = vmatprep.subr.mxu0 %v4319_v9  ;;  %3984 = vmatprep.subr.mxu1 %v4319_v9 }
 0x960   : > { %3972 = vmatmul.mubr.msk.f32.vlgmr.msra.gmra.mrb[20].mxu0 %vm723_vm2, %v2004_v17  ;;  %v2309_v25 = vpop.f32.mrb[24].mxu1 }
 0x961   : > { %3980 = vmatpush3.xpose.msk.msra.mxu0 %vm723_vm2, %v2087_v13  ;;  %v3968_v26 = vpop.f32.mrb[25].mxu1  ;;  %3977 = vmatmul.mubr.msk.f32.vlgmr.msra.gmra.mrb[26].mxu1 %vm723_vm2, %v2309_v25 }
 0x962   : > { %3981 = vmatprep.mubr.msk.f32.mxu0 %vm4318_vm0, %v4319_v9  ;;  %3985 = vmatpush3.msra.mxu1 %v2170_v24  ;;  %v1029_v26 = vsel %vm1028_vm4, %v4559_v42, -inf }
 0x963   : > { %3986 = vmatprep.mubr.msk.f32.mxu1 %vm4318_vm0, %v4319_v9  ;;  %4112 = vmatprep.subr.bf16.mxu1 %v4317_v3 }
 0x964   : > { %3982 = vmatmul.mubr.msk.f32.vlgmr.msra.gmra.mrb[22].mxu0 %vm723_vm2, %v2309_v25  ;;  %4106 = vmatprep.subr.bf16.mxu0 %v4317_v3 }
 0x965   : > { %3997 = vmatprep.mubr.msk.f32.mxu0 %vm4318_vm0, %v4319_v9  ;;  %4108 = vmatpush3.bf16.msra.mxu0 %v4107_v46 }
 0x966   : > { %4109 = vmatprep.subr.bf16.mxu0 %v4317_v3 }
 0x969   : > { %4111 = vmatpush3.bf16.msra.mxu0 %v4110_v49 }
 0x96a   : > { %4118 = vmatprep.subr.bf16.mxu0 %v4317_v3 }
 0x96c   : > { %3998 = vmatmul.mubr.msk.f32.vlgmr.msra.gmra.mrb[24].mxu0 %vm481_vm1, %v4482_v15  ;;  %v3657_v15 = vld [vmem:[%s5026_s6 + $0x70] sm:$0xff] }
 0x96d   : > { %4019 = vmatprep.mubr.msk.f32.mxu0 %vm4318_vm0, %v4319_v9  ;;  %v4116_v57 = vpack.c.bf16 %v3658_v56, %v3657_v15  ;;  %4120 = vmatpush3.bf16.msra.mxu0 %v4119_v63  ;;  %v1666_v15 = vsel %vm943_vm5, %v4665_v33, -inf }
 0x96e   : > { %4121 = vmatprep.subr.bf16.mxu0 %v4317_v3 }
 0xa33   : > { %v4765_v27 = vpop.f32.mrb[20].mxu0 }
 0xa34   : > { %v3973_v29 = vpop.f32.mrb[21].mxu0  ;;  %v4767_v30 = vpop.f32.mrb[26].mxu1 }
 0xa35   : > { %v3978_v31 = vpop.f32.mrb[27].mxu1  ;;  %v944_v29 = vsel %vm943_vm5, %v4557_v40, -inf }
 0xa36   : > { %v2389_v31 = vsel %vm943_vm5, %v4765_v27, -inf }
 0xa37   : > { %v2553_v32 = vpop.f32.mrb[22].mxu0 }
 0xa38   : > { %v3983_v34 = vpop.f32.mrb[23].mxu0  ;;  %v2557_v36 = vsel %vm1113_vm3, %v2553_v32, -inf }
 0xa39   : > { %2558 = vmax.xlane.f32.xlu0 %v2557_v36 }
 0xa3f   : > { %v2726_v58 = vpop.f32.mrb[24].mxu0 }
 0xa40   : > { %v3999_v59 = vpop.f32.mrb[25].mxu0 }
 0xac6   : > { %v2559_v37 = vpop.xlane.xlu0 %2558 }
 0xac7   : > { %v2560_v38 = vsub.f32 %v2553_v32, %v2559_v37 }
 0xac9   : > { %v2561_v39 = vmul.f32 1.442695, %v2560_v38 }
 0xacb   : > { %4181 = vpow2.f32 %v2561_v39 }
 0xad5   : > { %v4182_v41 = vpop.eup %4181 }
 0xad6   : > { %v2563_v43 = vsel %vm1113_vm3, %v4182_v41, 0.0 }
 0xad7   : > { %2564 = vadd.xlane.f32.xlu1 %v2563_v43 }
 0xb64   : > { %v2565_v50 = vpop.xlane.xlu1 %2564 }
 0xb65   : > { %4183 = vrcp.f32 %v2565_v50 }
 0xb6f   : > { %v4184_v53 = vpop.eup %4183 }
 0xb70   : > { %v2567_v55 = vmul.f32 %v4184_v53, %v4182_v41  ;;  %v1750_v53 = vsel %vm1028_vm4, %v4667_v35, -inf }
 0xb72   : > { %3987 = vmatmul.mubr.msk.f32.vlgmr.msra.gmra.mrb[28].mxu1 %vm723_vm2, %v2567_v55 }
 0xb73   : > { %4114 = vmatpush3.bf16.msra.mxu1 %v4113_v54  ;;  %4008 = vmatprep.mubr.msk.f32.mxu1 %vm4318_vm0, %v4319_v9 }
 0xb74   : > { %4115 = vmatprep.subr.bf16.mxu1 %v4317_v3  ;;  %v3653_v3 = vld [vmem:[%s5025_s5 + $0x3] ss:$0 sm:$0xff] }
 0xb75   : > { %v2727_v8 = vadd.f32 %v3653_v3, %v2726_v58 }
 0xb77   : > { %4117 = vmatpush3.bf16.msra.mxu1 %v4116_v57 }
 0xb78   : > { %4022 = vmatprep.subr.mxu1 %v4319_v9 }
 0xb7a   : > { %4009 = vmatmul.mubr.msk.f32.vlgmr.msra.gmra.mrb[30].mxu1 %vm481_vm1, %v4477_v14  ;;  %v3665_v14 = vld [vmem:[%s5028_s8 + $0x78] sm:$0xff] }
 0xb7b   : > { %4024 = vmatprep.mubr.msk.f32.mxu1 %vm4318_vm0, %v4319_v9  ;;  %v4122_v0 = vpack.c.bf16 %v3665_v14, %v3664_v62 }
 0xb7d   : > { %4123 = vmatpush3.bf16.msra.mxu0 %v4122_v0 }
 0xb7e   : > { %4032 = vmatprep.subr.mxu0 %v4319_v9 }
 0xb80   : > { %4020 = vmatmul.mubr.msk.f32.vlgmr.msra.gmra.mrb[26].mxu0 %vm481_vm1, %v4510_v22 }
 0xb81   : > { %4034 = vmatprep.mubr.msk.f32.mxu0 %vm4318_vm0, %v4319_v9 }
 0xc45   : > { %v2637_v1 = vpop.f32.mrb[28].mxu1 }
 0xc46   : > { %3647 = vst.msk [vmem:[%s4626_s2 + $0x8] sm:$0xf] %vm1113_vm3, %v2637_v1  ;;  %v3988_v2 = vpop.f32.mrb[29].mxu1 }
 0xc4d   : > { %v2809_v5 = vpop.f32.mrb[30].mxu1 }
 0xc4e   : > { %v2810_v6 = vadd.f32 %v3660_v4, %v2809_v5  ;;  %v4010_v7 = vpop.f32.mrb[31].mxu1 }
 0xc50   : > { %4023 = vmatpush3.msra.mxu1 %v2810_v6 }
 0xc51   : > { %4025 = vmatmul.mubr.msk.f32.vlgmr.msra.gmra.mrb[32].mxu1 %vm723_vm2, %v4526_v28  ;;  %4027 = vmatprep.subr.mxu1 %v4319_v9 }
 0xc52   : > { %4028 = vmatpush3.msra.mxu1 %v2727_v8  ;;  %4029 = vmatprep.mubr.msk.f32.mxu1 %vm4318_vm0, %v4319_v9 }
 0xc53   : > { %4037 = vmatprep.subr.mxu1 %v4319_v9  ;;  %v2892_v22 = vpop.f32.mrb[26].mxu0 }
 0xc54   : > { %v4021_v10 = vpop.f32.mrb[27].mxu0 }
 0xc55   : > { %4030 = vmatmul.mubr.msk.f32.vlgmr.msra.gmra.mrb[34].mxu1 %vm723_vm2, %v4526_v28  ;;  %v2893_v28 = vadd.f32 %v3667_v12, %v2892_v22 }
 0xc56   : > { %4039 = vmatprep.mubr.msk.f32.mxu1 %vm4318_vm0, %v4319_v9 }
 0xd24   : > { %v2962_v11 = vpop.f32.mrb[32].mxu1 }
 0xd25   : > { %4033 = vmatpush3.xpose.msk.msra.mxu0 %vm723_vm2, %v2962_v11  ;;  %v4026_v13 = vpop.f32.mrb[33].mxu1  ;;  %4038 = vmatpush3.xpose.msk.msra.mxu1 %vm723_vm2, %v2962_v11 }
 0xd26   : > { %4042 = vmatprep.subr.mxu0 %v4319_v9  ;;  %4047 = vmatprep.subr.mxu1 %v4319_v9 }
 0xd28   : > { %4035 = vmatmul.mubr.msk.f32.vlgmr.msra.gmra.mrb[28].mxu0 %vm723_vm2, %v2727_v8  ;;  %v3032_v16 = vpop.f32.mrb[34].mxu1 }
 0xd29   : > { %4043 = vmatpush3.xpose.msk.msra.mxu0 %vm723_vm2, %v2810_v6  ;;  %4044 = vmatprep.mubr.msk.f32.mxu0 %vm4318_vm0, %v4319_v9  ;;  %v4031_v17 = vpop.f32.mrb[35].mxu1 }
 0xd2a   : > { %4040 = vmatmul.mubr.msk.f32.vlgmr.msra.gmra.mrb[36].mxu1 %vm723_vm2, %v3032_v16 }
 0xd2b   : > { %4048 = vmatpush3.msra.mxu1 %v2893_v28  ;;  %4049 = vmatprep.mubr.msk.f32.mxu1 %vm4318_vm0, %v4319_v9  ;;  %v2473_v9 = vsel %vm1028_vm4, %v4767_v30, -inf }
 0xd2c   : > { %4045 = vmatmul.mubr.msk.f32.vlgmr.msra.gmra.mrb[30].mxu0 %vm723_vm2, %v3032_v16 }
 0xdfb   : > { %v4861_v18 = vpop.f32.mrb[28].mxu0 }
 0xdfc   : > { %v4036_v19 = vpop.f32.mrb[29].mxu0  ;;  %v3112_v58 = vsel %vm943_vm5, %v4861_v18, -inf }
 0xdfd   : > { %v4863_v20 = vpop.f32.mrb[36].mxu1 }
 0xdfe   : > { %v4041_v21 = vpop.f32.mrb[37].mxu1  ;;  %v3196_v54 = vsel %vm1028_vm4, %v4863_v20, -inf }
 0xdff   : > { %v3276_v23 = vpop.f32.mrb[30].mxu0 }
 0xe00   : > { %v3280_v24 = vsel %vm1113_vm3, %v3276_v23, -inf  ;;  %v4046_v25 = vpop.f32.mrb[31].mxu0 }
 0xe01   : > { %3281 = vmax.xlane.f32.xlu0 %v3280_v24 }
 0xe05   : > { %1030 = vmax.xlane.f32.xlu0 %v1029_v26 }
 0xe09   : > { %2474 = vmax.xlane.f32.xlu0 %v2473_v9 }
 0xe0d   : > { %945 = vmax.xlane.f32.xlu0 %v944_v29 }
 0xe11   : > { %2390 = vmax.xlane.f32.xlu0 %v2389_v31 }
 0xe8e   : > { %v3282_v32 = vpop.xlane.xlu0 %3281 }
 0xe8f   : > { %v3283_v34 = vsub.f32 %v3276_v23, %v3282_v32 }
 0xe91   : > { %v3284_v36 = vmul.f32 1.442695, %v3283_v34 }
 0xe92   : > { %v1031_v37 = vpop.xlane.xlu0 %1030 }
 0xe93   : > { %4185 = vpow2.f32 %v3284_v36  ;;  %v1032_v38 = vsub.f32 %v4559_v42, %v1031_v37 }
 0xe95   : > { %v1033_v39 = vmul.f32 1.442695, %v1032_v38 }
 0xe96   : > { %v2475_v41 = vpop.xlane.xlu0 %2474 }
 0xe97   : > { %4187 = vpow2.f32 %v1033_v39  ;;  %v2476_v43 = vsub.f32 %v4767_v30, %v2475_v41 }
 0xe99   : > { %v2477_v44 = vmul.f32 1.442695, %v2476_v43 }
 0xe9a   : > { %v946_v45 = vpop.xlane.xlu0 %945 }
 0xe9b   : > { %4189 = vpow2.f32 %v2477_v44  ;;  %v947_v46 = vsub.f32 %v4557_v40, %v946_v45 }
 0xe9d   : > { %v4186_v47 = vpop.eup %4185  ;;  %v948_v48 = vmul.f32 1.442695, %v947_v46 }
 0xe9e   : > { %v2391_v49 = vpop.xlane.xlu0 %2390  ;;  %v3286_v50 = vsel %vm1113_vm3, %v4186_v47, 0.0 }
 0xe9f   : > { %4191 = vpow2.f32 %v948_v48  ;;  %v2392_v51 = vsub.f32 %v4765_v27, %v2391_v49  ;;  %3287 = vadd.xlane.f32.xlu1 %v3286_v50 }
 0xea1   : > { %v4188_v42 = vpop.eup %4187  ;;  %v2393_v52 = vmul.f32 1.442695, %v2392_v51 }
 0xea2   : > { %v1035_v30 = vsel %vm1028_vm4, %v4188_v42, 0.0 }
 0xea3   : > { %4193 = vpow2.f32 %v2393_v52  ;;  %1751 = vmax.xlane.f32.xlu1 %v1750_v53  ;;  %1036 = vadd.xlane.f32.xlu0 %v1035_v30 }
 0xea5   : > { %v4190_v40 = vpop.eup %4189 }
 0xea6   : > { %v2479_v55 = vsel %vm1028_vm4, %v4190_v40, 0.0 }
 0xea7   : > { %3197 = vmax.xlane.f32.xlu1 %v3196_v54  ;;  %2480 = vadd.xlane.f32.xlu0 %v2479_v55 }
 0xea9   : > { %v4192_v27 = vpop.eup %4191 }
 0xeaa   : > { %v950_v56 = vsel %vm943_vm5, %v4192_v27, 0.0 }
 0xeab   : > { %1667 = vmax.xlane.f32.xlu1 %v1666_v15  ;;  %951 = vadd.xlane.f32.xlu0 %v950_v56 }
 0xead   : > { %v4194_v57 = vpop.eup %4193 }
 0xeae   : > { %v2395_v59 = vsel %vm943_vm5, %v4194_v57, 0.0 }
 0xeaf   : > { %3113 = vmax.xlane.f32.xlu1 %v3112_v58  ;;  %2396 = vadd.xlane.f32.xlu0 %v2395_v59 }
 0xf2c   : > { %v3288_v60 = vpop.xlane.xlu1 %3287 }
 0xf2d   : > { %4195 = vrcp.f32 %v3288_v60 }
 0xf30   : > { %v1752_v61 = vpop.xlane.xlu1 %1751  ;;  %v1037_v62 = vpop.xlane.xlu0 %1036 }
 0xf31   : > { %v1753_v63 = vsub.f32 %v4667_v35, %v1752_v61  ;;  %4197 = vrcp.f32 %v1037_v62 }
 0xf33   : > { %v1754_v14 = vmul.f32 1.442695, %v1753_v63 }
 0xf34   : > { %v3198_v0 = vpop.xlane.xlu1 %3197  ;;  %v2481_v1 = vpop.xlane.xlu0 %2480 }
 0xf35   : > { %4199 = vpow2.f32 %v1754_v14  ;;  %v3199_v2 = vsub.f32 %v4863_v20, %v3198_v0 }
 0xf36   : > { %4201 = vrcp.f32 %v2481_v1 }
 0xf37   : > { %v4196_v4 = vpop.eup %4195  ;;  %v3200_v3 = vmul.f32 1.442695, %v3199_v2 }
 0xf38   : > { %v3290_v5 = vmul.f32 %v4196_v4, %v4186_v47  ;;  %v1668_v6 = vpop.xlane.xlu1 %1667  ;;  %v952_v7 = vpop.xlane.xlu0 %951 }
 0xf39   : > { %4203 = vpow2.f32 %v3200_v3  ;;  %v1669_v8 = vsub.f32 %v4665_v33, %v1668_v6 }
 0xf3a   : > { %4205 = vrcp.f32 %v952_v7  ;;  %4050 = vmatmul.mubr.msk.f32.vlgmr.msra.gmra.mrb[38].mxu1 %vm723_vm2, %v3290_v5 }
 0xf3b   : > { %v4198_v35 = vpop.eup %4197  ;;  %v1670_v22 = vmul.f32 1.442695, %v1669_v8 }
 0xf3c   : > { %v1039_v10 = vmul.f32 %v4198_v35, %v4188_v42  ;;  %v3114_v11 = vpop.xlane.xlu1 %3113  ;;  %v2397_v12 = vpop.xlane.xlu0 %2396 }
 0xf3d   : > { %4207 = vpow2.f32 %v1670_v22  ;;  %v3115_v13 = vsub.f32 %v4861_v18, %v3114_v11 }
 0xf3e   : > { %1199 = vst.msk [vmem:[%s4898_s26] sm:$0xf] %vm1028_vm4, %v1039_v10  ;;  %4209 = vrcp.f32 %v2397_v12 }
 0xf3f   : > { %v4200_v33 = vpop.eup %4199  ;;  %v3116_v28 = vmul.f32 1.442695, %v3115_v13 }
 0xf40   : > { %v4202_v16 = vpop.eup %4201  ;;  %v1756_v17 = vsel %vm1028_vm4, %v4200_v33, 0.0 }
 0xf41   : > { %v2483_v19 = vmul.f32 %v4202_v16, %v4190_v40  ;;  %4211 = vpow2.f32 %v3116_v28  ;;  %1757 = vadd.xlane.f32.xlu1 %v1756_v17 }
 0xf43   : > { %v4204_v20 = vpop.eup %4203  ;;  %3646 = vst.msk [vmem:[%s4898_s26 + $0x8] sm:$0xf] %vm1028_vm4, %v2483_v19 }
 0xf44   : > { %v4206_v18 = vpop.eup %4205  ;;  %v3202_v21 = vsel %vm1028_vm4, %v4204_v20, 0.0 }
 0xf45   : > { %v954_v23 = vmul.f32 %v4206_v18, %v4192_v27  ;;  %3203 = vadd.xlane.f32.xlu1 %v3202_v21 }
 0xf47   : > { %v4208_v24 = vpop.eup %4207  ;;  %1198 = vst.msk [vmem:[%s4909_s29] sm:$0xff] %vm943_vm5, %v954_v23 }
 0xf48   : > { %v4210_v25 = vpop.eup %4209  ;;  %v1672_v26 = vsel %vm943_vm5, %v4208_v24, 0.0 }
 0xf49   : > { %v2399_v9 = vmul.f32 %v4210_v25, %v4194_v57  ;;  %1673 = vadd.xlane.f32.xlu1 %v1672_v26 }
 0xf4b   : > { %v4212_v29 = vpop.eup %4211  ;;  %3645 = vst.msk [vmem:[%s4909_s29 + $0x10] sm:$0xff] %vm943_vm5, %v2399_v9 }
 0xf4c   : > { %v3118_v31 = vsel %vm943_vm5, %v4212_v29, 0.0 }
 0xf4d   : > { %3119 = vadd.xlane.f32.xlu1 %v3118_v31 }
 0xfce   : > { %v1758_v32 = vpop.xlane.xlu1 %1757 }
 0xfcf   : > { %4213 = vrcp.f32 %v1758_v32 }
 0xfd2   : > { %v3204_v34 = vpop.xlane.xlu1 %3203 }
 0xfd3   : > { %4215 = vrcp.f32 %v3204_v34 }
 0xfd6   : > { %v1674_v36 = vpop.xlane.xlu1 %1673 }
 0xfd7   : > { %4217 = vrcp.f32 %v1674_v36 }
 0xfd9   : > { %v4214_v37 = vpop.eup %4213 }
 0xfda   : > { %v1760_v38 = vmul.f32 %v4214_v37, %v4200_v33  ;;  %v3120_v39 = vpop.xlane.xlu1 %3119 }
 0xfdb   : > { %4219 = vrcp.f32 %v3120_v39 }
 0xfdc   : > { %3613 = vst.msk [vmem:[%s4898_s26 + $0x4] sm:$0xf] %vm1028_vm4, %v1760_v38 }
 0xfdd   : > { %v4216_v41 = vpop.eup %4215 }
 0xfde   : > { %v3206_v43 = vmul.f32 %v4216_v41, %v4204_v20 }
 0xfe0   : > { %3679 = vst.msk [vmem:[%s4898_s26 + $0xc] sm:$0xf] %vm1028_vm4, %v3206_v43 }
 0xfe1   : > { %v4218_v44 = vpop.eup %4217 }
 0xfe2   : > { %4234 = shalt.err (!%p4231_p3)
}
 0xfe3   : > { %s4235_s26 = scalar_lea.hbm %s4929_s15, 256  ;;  %s4239_s0 = scalar_lea.hbm %s5031_s11, 512 }
 0xfe4   : > { %p4236_p4 = scmp.ne.s32.totalorder %s4929_s15, %s4235_s26  ;;  %p4240_p9 = scmp.lt.u32.totalorder %s4929_s15, %s5031_s11 }
 0xfe5   : > { %p4241_p10 = scmp.lt.u32.totalorder %s4239_s0, %s4235_s26  ;;  %p4243_p12 = scmp.lt.u32.totalorder %s4235_s26, %s4929_s15 }
 0xfe6   : > { %p4237_p7 = pnand %p4236_p4, %p4427_p5 }
 0xfe7   : > { %p4242_p11 = por %p4241_p10, %p4240_p9 }
 0xfe8   : > { %p4238_p8 = pneg %p4237_p7 }
 0xfe9   : > { %p4244_p13 = por %p4243_p12, %p4242_p11 }
 0xfeb   : > { %p4245_p0 = pnand %p4244_p13, %p4238_p8 }
 0xfed   : > { %4248 = shalt.err (!%p4245_p0)
}
 0xfee   : > { %s4321_s4 = smov 64   ;;  %s4322_s16 = smov 4   ;;  %v1676_v45 = vmul.f32 %v4218_v44, %v4208_v24  ;;  %v4220_v46 = vpop.eup %4219 }
 0xfef   : > { %4124 = dma.vmem_to_hbm [thread:$0]  (%p4427_p5), %s4922_s28, 256, %s4929_s15, %s3376_s1, %s4321_s4, %s4321_s4, %s4322_s16   ;;  %v3122_v47 = vmul.f32 %v4220_v46, %v4212_v29 }
 0xff0   : > { %3612 = vst.msk [vmem:[%s4909_s29 + $0x8] sm:$0xff] %vm943_vm5, %v1676_v45  ;;  %s3413_s19 = sshll.u32 %s4626_s2, 4  ;;  %s5048_s26 = sshll.u32 %s4410_s25, 8  ;;  %s4965_s19 = int_to_ptr.vmem [resolvable:$true] %s3413_s19 }
 0xff1   : > { %3678 = vst.msk [vmem:[%s4909_s29 + $0x18] sm:$0xff] %vm943_vm5, %v3122_v47  ;;  %s4972_s0 = scalar_lea.hbm %s5032_s12, %s5048_s26  ;;  %s3381_s28 = scalar_lea.sflag [#allocation5], %s4621_s17 }
 0xff2   : > { %s4249_s15 = scalar_lea.vmem %s4965_s19, 256  ;;  %s4323_s29 = smov [#allocation4]  }
 0xff3   : > { %p4250_p1 = scmp.ne.s32.totalorder %s4965_s19, %s4249_s15  ;;  %s4253_s25 = sshll.u32 %s4323_s29, 4  ;;  %s4254_s25 = int_to_ptr.vmem [resolvable:$false] %s4253_s25 }
 0xff4   : > { %s4255_s1 = scalar_lea.vmem %s4254_s25, 512  ;;  %p4256_p4 = scmp.lt.s32.totalorder %s4965_s19, %s4254_s25 }
 0xff5   : > { %p4251_p2 = pnand %p4250_p1, %p4427_p5  ;;  %p4257_p7 = scmp.lt.s32.totalorder %s4255_s1, %s4249_s15 }
 0xff7   : > { %p4252_p3 = pneg %p4251_p2  ;;  %p4258_p8 = por %p4257_p7, %p4256_p4 }
 0xff9   : > { %p4259_p9 = pnand %p4258_p8, %p4252_p3 }
0x100d   : > { %v3360_v48 = vpop.f32.mrb[38].mxu1 }
0x100e   : > { %3680 = vst.msk [vmem:[%s4626_s2 + $0xc] sm:$0xf] %vm1113_vm3, %v3360_v48  ;;  %v4051_v49 = vpop.f32.mrb[39].mxu1 }
0x100f   : > { %4262 = shalt.err (!%p4259_p9)
}
0x1010   : > { %s4263_s2 = scalar_lea.hbm %s4972_s0, 256  ;;  %s4267_s20 = scalar_lea.hbm %s5032_s12, 512 }
0x1011   : > { %p4264_p10 = scmp.ne.s32.totalorder %s4972_s0, %s4263_s2  ;;  %p4268_p13 = scmp.lt.u32.totalorder %s4972_s0, %s5032_s12 }
0x1012   : > { %p4269_p0 = scmp.lt.u32.totalorder %s4267_s20, %s4263_s2  ;;  %p4271_p2 = scmp.lt.u32.totalorder %s4263_s2, %s4972_s0 }
0x1013   : > { %p4265_p11 = pnand %p4264_p10, %p4427_p5 }
0x1014   : > { %p4270_p1 = por %p4269_p0, %p4268_p13 }
0x1015   : > { %p4266_p12 = pneg %p4265_p11 }
0x1016   : > { %p4272_p3 = por %p4271_p2, %p4270_p1 }
0x1018   : > { %p4273_p4 = pnand %p4272_p3, %p4266_p12 }
0x101a   : > { %4276 = shalt.err (!%p4273_p4)
}
0x101b   : > { %4125 = dma.vmem_to_hbm [thread:$0]  (%p4427_p5), %s4965_s19, 256, %s4972_s0, %s3381_s28, %s4321_s4, %s4321_s4, %s4322_s16  }
0x101c PF: > { %p4135_p7 = scmp.ge.s32.totalorder %s4315_s24, 2  ;;  %s3436_s15 = sand.u32 1, %s4303_s21  }
0x101d   : > { %s3437_s25 = scalar_lea.sflag [#allocation3], %s3436_s15 }
0x101e   : > { %p4129_p8 = pnand %p4135_p7, %p4431_p6 }
0x1020   : > { %4294 = dma.done.wait (!%p4129_p8), %s3437_s25, 256  }
0x1021   : > { %4296 = vsyncadd (!%p4129_p8), %s3437_s25, 4294967040  ;;  %s3446_s13 = scalar_lea.sflag [#allocation5], %s3436_s15 }
0x1022   : > { %4298 = dma.done.wait (!%p4129_p8), %s3446_s13, 256  }
0x1023   : > { %4300 = vsyncadd (!%p4129_p8), %s3446_s13, 4294967040  ;;  %p26_p5 = scmp.ge.s32.totalorder %s4414_s27, 4   ;;  %s5049_s21 = smov %s4307_s22 }
0x1024   : > { %s5050_s22 = smov %s4311_s23  ;;  %s5051_s23 = smov %s4425_s30 }
0x1025   : > { %s5052_s24 = smov %s4414_s27  ;;  %28 = sbr.rel (!%p26_p5) target bundleno = 11 (0xb), region = 157 }
0x102c   :  { %3451 = vsyncpa [#allocation3], 1 }
0x102d   :  { %3453 = vsyncpa [#allocation3 + $0x1], 1 }
0x102e   :  { %3454 = vsyncpa [#allocation5], 1 }
0x102f   :  { %3456 = vsyncpa [#allocation5 + $0x1], 1 }

</bundles_post_ra>
